<compile_context>
chip_gen: v6e
topology: v6e:2x2x1
jax: 0.10.0
libtpu: 0.0.40
codegen_flags: <defaults>
</compile_context>

<pallas_src>
import jax
import jax.numpy as jnp
from jax.experimental import pallas as pl
from jax.experimental.pallas import tpu as pltpu


# ----------------------------- Pallas kernel --------------------------------
def _signinv_kernel(a_ref, xwh_ref, xwl_ref, b1_ref, w23_ref, b3_ref,
                    w4_ref, b4_ref, o_ref, agg_ref):
    # a_ref   : [TN, TK]   bf16 adjacency tile (A + I, exact small-int counts)
    # xwh_ref : [TK, K*H]  bf16 hi part of Xw
    # xwl_ref : [TK, K*H]  bf16 lo part of Xw   (Xw ~= hi + lo, near-f32)
    # b1_ref  : [1, K*H]   b1 tiled K times (f32)
    # w23_ref : [K*H, R]   fused  w2 . w3 (f32)
    # b3_ref  : [1, R]     b3 + (2*b2 tiled K) @ w3 (f32)
    # w4_ref  : [R, Op]    lane-padded (f32)
    # b4_ref  : [1, Op]    lane-padded (f32)
    # o_ref   : [TN, Op]   f32 output slab
    # agg_ref : [TN, K*H]  f32 accumulator scratch (resident across k steps)
    k = pl.program_id(1)

    @pl.when(k == 0)
    def _():
        agg_ref[...] = jnp.zeros_like(agg_ref)

    # Dominant N^2 work: bf16 x bf16 MXU matmuls, f32 accumulation.
    #   agg[n, k*H+h] = ((1+eps)*x + A@x)[n, k] * w1[h],  eps = 0
    a = a_ref[...]
    agg_ref[...] += (
        jnp.dot(a, xwh_ref[...], preferred_element_type=jnp.float32)
        + jnp.dot(a, xwl_ref[...], preferred_element_type=jnp.float32))

    @pl.when(k == pl.num_programs(1) - 1)
    def _():
        agg = agg_ref[...]                                              # [TN, K*H]
        b1b = jnp.broadcast_to(b1_ref[...], agg.shape)                  # hoisted (used twice)
        # merged phi branches:  relu(agg + b1) + relu(-agg + b1)
        h = jnp.maximum(agg + b1b, 0.0) + jnp.maximum(b1b - agg, 0.0)
        # phi's Linear(H->H) folded into rho's first Linear(K*H->R)
        z = jnp.dot(h, w23_ref[...], preferred_element_type=jnp.float32) + b3_ref[...]
        z = jnp.maximum(z, 0.0)                                         # [TN, R]
        out = jnp.dot(z, w4_ref[...], preferred_element_type=jnp.float32) + b4_ref[...]
        o_ref[...] = out.astype(o_ref.dtype)                            # [TN, Op]


# ------------------------------ wrapper --------------------------------------
def sign_inv_pe(Lambda, V, edge_index, batch, params, *, tile_n=256, tile_k=1024):
    """Pallas implementation of SignInvPe.forward. Lambda/batch unused (as in torch)."""
    del Lambda, batch
    w1, b1, w2, b2, w3, b3, w4, b4 = params
    N, K = V.shape
    H = w2.shape[0]
    R = w3.shape[1]
    O = w4.shape[1]
    KH = K * H

    # Pad the node count to a multiple of tile_n, then to a multiple of the
    # (clamped) contraction tile so both grid axes divide evenly.  Output lanes
    # are padded to 128 (lane-dense, unmasked stores).
    n_pad = int(pl.cdiv(N, tile_n)) * tile_n
    tile_k = max(tile_n, min(tile_k, n_pad))
    tile_k = (tile_k // tile_n) * tile_n            # keep tile_k a multiple of tile_n
    n_pad = int(pl.cdiv(n_pad, tile_k)) * tile_k
    o_pad = int(pl.cdiv(O, 128)) * 128

    # Glue: densify edge_index directly into a bf16 adjacency (exact small-int
    # counts), with the GIN self term folded in as +I on the diagonal.
    # TODO(synk): for large/sparse graphs this dense A should be replaced by a
    # scalar-prefetch CSR + gather-DMA aggregation kernel; dense is the small-N path.
    ones_e = jnp.ones((edge_index.shape[1],), jnp.bfloat16)
    ones_n = jnp.ones((N,), jnp.bfloat16)
    self_idx = jnp.arange(N, dtype=edge_index.dtype)
    A = (jnp.zeros((n_pad, n_pad), jnp.bfloat16)
         .at[edge_index[1], edge_index[0]].add(ones_e)
         .at[self_idx, self_idx].add(ones_n))                          # A' = A + I

    V_pad = jnp.pad(V.astype(jnp.float32), ((0, n_pad - N), (0, 0)))

    # --- algebraic pre-computation (tiny, runs once outside the kernel) -------
    # Xw[n, k*H + h] = V[n, k] * w1[h]   (w1 is linear, commutes with A' @ .)
    Xw = (V_pad[:, :, None] * w1[0][None, None, :]).reshape(n_pad, KH)
    # hi/lo bf16 split -> two bf16 MXU matmuls with near-f32 accuracy.
    Xw_hi = Xw.astype(jnp.bfloat16)
    Xw_lo = (Xw - Xw_hi.astype(jnp.float32)).astype(jnp.bfloat16)

    b1_t = jnp.tile(b1, (1, K))                                        # [1, K*H]
    # Fold phi's Linear(H->H) into rho's first Linear (no nonlinearity between):
    #   W23[k*H+i, r] = sum_o w2[i,o] * w3[k*H+o, r]
    w3_r = w3.reshape(K, H, R)
    W23 = jnp.einsum('io,kor->kir', w2, w3_r).reshape(KH, R)           # [K*H, R]
    b3_eff = b3 + (2.0 * jnp.tile(b2, (1, K))) @ w3                    # [1, R]
    w4_p = jnp.pad(w4, ((0, 0), (0, o_pad - O)))
    b4_p = jnp.pad(b4, ((0, 0), (0, o_pad - O)))

    grid = (n_pad // tile_n, n_pad // tile_k)
    const = lambda i, k: (0, 0)

    cost = pl.CostEstimate(
        flops=4 * n_pad * n_pad * KH                       # hi + lo bf16 matmuls
        + 2 * n_pad * KH * R + 2 * n_pad * R * o_pad,
        transcendentals=0,
        bytes_accessed=n_pad * n_pad * 2                   # A' (bf16), streamed once
        + grid[0] * n_pad * KH * 2 * 2                     # Xw hi+lo, re-read per row tile
        + (KH * R + R * o_pad + KH + R + o_pad) * 4        # weights / biases
        + n_pad * o_pad * 4,                               # f32 output slab
    )

    out = pl.pallas_call(
        _signinv_kernel,
        out_shape=jax.ShapeDtypeStruct((n_pad, o_pad), jnp.float32),
        grid=grid,
        in_specs=[
            pl.BlockSpec((tile_n, tile_k), lambda i, k: (i, k)),   # A' tile (bf16)
            pl.BlockSpec((tile_k, KH), lambda i, k: (k, 0)),       # Xw hi (bf16)
            pl.BlockSpec((tile_k, KH), lambda i, k: (k, 0)),       # Xw lo (bf16)
            pl.BlockSpec((1, KH), const),                          # b1 tiled
            pl.BlockSpec((KH, R), const),                          # fused W23
            pl.BlockSpec((1, R), const),                           # b3_eff
            pl.BlockSpec((R, o_pad), const),                       # w4 (lane padded)
            pl.BlockSpec((1, o_pad), const),                       # b4 (lane padded)
        ],
        out_specs=pl.BlockSpec((tile_n, o_pad), lambda i, k: (i, 0)),
        scratch_shapes=[pltpu.VMEM((tile_n, KH), jnp.float32)],    # agg accumulator
        compiler_params=pltpu.CompilerParams(
            dimension_semantics=("parallel", "arbitrary"),
            vmem_limit_bytes=32 * 1024 * 1024),
        cost_estimate=cost,
    )(A, Xw_hi, Xw_lo, b1_t, W23, b3_eff, w4_p, b4_p)

    return out[:N, :O]


# --------------------------- pure-JAX reference -------------------------------
def sign_inv_pe_ref(V, A, params):
    w1, b1, w2, b2, w3, b3, w4, b4 = params

    def phi(x):                                   # x: [N, K, 1]
        agg = x + jnp.einsum('nm,mkf->nkf', A, x)
        h = jnp.maximum(agg @ w1 + b1, 0.0)
        return h @ w2 + b2

    x = V[..., None]
    h = phi(x) + phi(-x)
    flat = h.reshape(V.shape[0], -1)
    z = jnp.maximum(flat @ w3 + b3, 0.0)
    return z @ w4 + b4


# --------------------------------- main ---------------------------------------
if __name__ == "__main__":
    # nodes, eigvecs, phi hidden, rho hidden, out  (N deliberately not a
    # multiple of tile_n to exercise the tail/padding path).
    N, K, H, R, O = 500, 8, 16, 32, 8

    key = jax.random.PRNGKey(0)
    kV, kL, k1, k2, k3, k4 = jax.random.split(key, 6)

    Lambda = jax.random.normal(kL, (N, K), jnp.float32)            # unused by forward
    V = jax.random.normal(kV, (N, K), jnp.float32)                 # eigenvectors
    batch = jnp.zeros((N,), jnp.int32)                             # unused by forward

    # ring graph, both directions -> edge_index [2, E]
    src = jnp.arange(N, dtype=jnp.int32)
    dst = (src + 1) % N
    edge_index = jnp.concatenate(
        [jnp.stack([src, dst]), jnp.stack([dst, src])], axis=1)     # [2, 2N]

    # deterministic parameter init (synthetic, not a checkpoint)
    scale = 0.1
    w1 = scale * jax.random.normal(k1, (1, H), jnp.float32)
    b1 = jnp.full((1, H), 0.01, jnp.float32)
    w2 = scale * jax.random.normal(k2, (H, H), jnp.float32)
    b2 = jnp.full((1, H), 0.01, jnp.float32)
    w3 = scale * jax.random.normal(k3, (K * H, R), jnp.float32)
    b3 = jnp.full((1, R), 0.01, jnp.float32)
    w4 = scale * jax.random.normal(k4, (R, O), jnp.float32)
    b4 = jnp.full((1, O), 0.01, jnp.float32)
    params = (w1, b1, w2, b2, w3, b3, w4, b4)

    fwd = jax.jit(lambda Lm, Vv, ei, bb: sign_inv_pe(Lm, Vv, ei, bb, params))
    out = jax.block_until_ready(fwd(Lambda, V, edge_index, batch))

    A_ref = jnp.zeros((N, N), jnp.float32).at[edge_index[1], edge_index[0]].add(1.0)
    ref = sign_inv_pe_ref(V, A_ref, params)

    assert out.shape == (N, O)
    assert jnp.allclose(out, ref, rtol=3e-4, atol=3e-5), (
        f"max abs err = {jnp.max(jnp.abs(out - ref))}")

    print("KERNEL_OK")
</pallas_src>

<mosaic_0001>
module attributes {stable_mosaic.version = 11 : i64} {
  func.func @_signinv_kernel(%arg0: i32, %arg1: i32, %arg2: memref<256x512xbf16, #tpu.memory_space<vmem>>, %arg3: memref<512x128xbf16, #tpu.memory_space<vmem>>, %arg4: memref<512x128xbf16, #tpu.memory_space<vmem>>, %arg5: memref<1x128xf32, #tpu.memory_space<vmem>>, %arg6: memref<128x32xf32, #tpu.memory_space<vmem>>, %arg7: memref<1x32xf32, #tpu.memory_space<vmem>>, %arg8: memref<32x128xf32, #tpu.memory_space<vmem>>, %arg9: memref<1x128xf32, #tpu.memory_space<vmem>>, %arg10: memref<256x128xf32, #tpu.memory_space<vmem>>, %arg11: memref<256x128xf32, #tpu.memory_space<vmem>>) attributes {dimension_semantics = [#tpu.dimension_semantics<parallel>, #tpu.dimension_semantics<arbitrary>], iteration_bounds = array<i64: 2, 1>, scalar_prefetch = 0 : i64, scratch_operands = 1 : i64, tpu.core_type = #tpu.core_type<tc>, window_params = [{transform_indices = @transform_0, window_bounds = array<i64: 256, 512>}, {transform_indices = @transform_1, window_bounds = array<i64: 512, 128>}, {transform_indices = @transform_2, window_bounds = array<i64: 512, 128>}, {pipeline_mode = #tpu.pipeline_mode<synchronous>, transform_indices = @transform_3, window_bounds = array<i64: 1, 128>}, {pipeline_mode = #tpu.pipeline_mode<synchronous>, transform_indices = @transform_4, window_bounds = array<i64: 128, 32>}, {pipeline_mode = #tpu.pipeline_mode<synchronous>, transform_indices = @transform_5, window_bounds = array<i64: 1, 32>}, {pipeline_mode = #tpu.pipeline_mode<synchronous>, transform_indices = @transform_6, window_bounds = array<i64: 32, 128>}, {pipeline_mode = #tpu.pipeline_mode<synchronous>, transform_indices = @transform_7, window_bounds = array<i64: 1, 128>}, {transform_indices = @transform_8, window_bounds = array<i64: 256, 128>}]} {
    %c0_i32 = arith.constant 0 : i32
    %0 = arith.cmpi eq, %arg1, %c0_i32 : i32
    %1 = arith.extui %0 : i1 to i32
    %c0_i32_0 = arith.constant 0 : i32
    %2 = arith.cmpi ne, %1, %c0_i32_0 : i32
    scf.if %2 {
      %cst_13 = arith.constant 0.000000e+00 : f32
      %15 = vector.broadcast %cst_13 : f32 to vector<256x128xf32>
      %c0_14 = arith.constant 0 : index
      %c0_15 = arith.constant 0 : index
      %16 = vector.load %arg11[%c0_14, %c0_15] : memref<256x128xf32, #tpu.memory_space<vmem>>, vector<256x128xf32>
      tpu.vector_store %arg11[%c0_14, %c0_15], %15 {strides = array<i32>} : memref<256x128xf32, #tpu.memory_space<vmem>>, vector<256x128xf32>,
    } else {
    }
    %c0 = arith.constant 0 : index
    %c0_1 = arith.constant 0 : index
    %3 = vector.load %arg2[%c0, %c0_1] : memref<256x512xbf16, #tpu.memory_space<vmem>>, vector<256x512xbf16>
    %c0_2 = arith.constant 0 : index
    %c0_3 = arith.constant 0 : index
    %4 = vector.load %arg11[%c0_2, %c0_3] : memref<256x128xf32, #tpu.memory_space<vmem>>, vector<256x128xf32>
    %c0_4 = arith.constant 0 : index
    %c0_5 = arith.constant 0 : index
    %5 = vector.load %arg3[%c0_4, %c0_5] : memref<512x128xbf16, #tpu.memory_space<vmem>>, vector<512x128xbf16>
    %cst = arith.constant dense<0.000000e+00> : vector<256x128xf32>
    %6 = tpu.matmul %3, %5, %cst {dimension_numbers = #tpu.dot_dimension_numbers<[1], [0], [0], [1], [0, 0, 1, 1], [], []>} : vector<256x512xbf16>, vector<512x128xbf16>, vector<256x128xf32> -> vector<256x128xf32>
    %c0_6 = arith.constant 0 : index
    %c0_7 = arith.constant 0 : index
    %7 = vector.load %arg4[%c0_6, %c0_7] : memref<512x128xbf16, #tpu.memory_space<vmem>>, vector<512x128xbf16>
    %cst_8 = arith.constant dense<0.000000e+00> : vector<256x128xf32>
    %8 = tpu.matmul %3, %7, %cst_8 {dimension_numbers = #tpu.dot_dimension_numbers<[1], [0], [0], [1], [0, 0, 1, 1], [], []>} : vector<256x512xbf16>, vector<512x128xbf16>, vector<256x128xf32> -> vector<256x128xf32>
    %9 = arith.addf %6, %8 : vector<256x128xf32>
    %10 = arith.addf %4, %9 : vector<256x128xf32>
    %c0_9 = arith.constant 0 : index
    %c0_10 = arith.constant 0 : index
    %11 = vector.load %arg11[%c0_9, %c0_10] : memref<256x128xf32, #tpu.memory_space<vmem>>, vector<256x128xf32>
    tpu.vector_store %arg11[%c0_9, %c0_10], %10 {strides = array<i32>} : memref<256x128xf32, #tpu.memory_space<vmem>>, vector<256x128xf32>,
    %c0_i32_11 = arith.constant 0 : i32
    %12 = arith.cmpi eq, %arg1, %c0_i32_11 : i32
    %13 = arith.extui %12 : i1 to i32
    %c0_i32_12 = arith.constant 0 : i32
    %14 = arith.cmpi ne, %13, %c0_i32_12 : i32
    scf.if %14 {
      %c0_13 = arith.constant 0 : index
      %c0_14 = arith.constant 0 : index
      %15 = vector.load %arg11[%c0_13, %c0_14] : memref<256x128xf32, #tpu.memory_space<vmem>>, vector<256x128xf32>
      %c0_15 = arith.constant 0 : index
      %c0_16 = arith.constant 0 : index
      %16 = vector.load %arg5[%c0_15, %c0_16] : memref<1x128xf32, #tpu.memory_space<vmem>>, vector<1x128xf32>
      %17 = vector.shape_cast %16 : vector<1x128xf32> to vector<1x128xf32>
      %18 = vector.broadcast %17 : vector<1x128xf32> to vector<256x128xf32>
      %19 = arith.addf %15, %18 : vector<256x128xf32>
      %cst_17 = arith.constant 0.000000e+00 : f32
      %20 = vector.broadcast %cst_17 : f32 to vector<256x128xf32>
      %21 = arith.maximumf %19, %20 : vector<256x128xf32>
      %22 = arith.subf %18, %15 : vector<256x128xf32>
      %cst_18 = arith.constant 0.000000e+00 : f32
      %23 = vector.broadcast %cst_18 : f32 to vector<256x128xf32>
      %24 = arith.maximumf %22, %23 : vector<256x128xf32>
      %25 = arith.addf %21, %24 : vector<256x128xf32>
      %c0_19 = arith.constant 0 : index
      %c0_20 = arith.constant 0 : index
      %26 = vector.load %arg6[%c0_19, %c0_20] : memref<128x32xf32, #tpu.memory_space<vmem>>, vector<128x32xf32>
      %cst_21 = arith.constant dense<0.000000e+00> : vector<256x32xf32>
      %27 = tpu.matmul %25, %26, %cst_21 {dimension_numbers = #tpu.dot_dimension_numbers<[1], [0], [0], [1], [0, 0, 1, 1], [], []>} : vector<256x128xf32>, vector<128x32xf32>, vector<256x32xf32> -> vector<256x32xf32>
      %c0_22 = arith.constant 0 : index
      %c0_23 = arith.constant 0 : index
      %28 = vector.load %arg7[%c0_22, %c0_23] : memref<1x32xf32, #tpu.memory_space<vmem>>, vector<1x32xf32>
      %29 = vector.broadcast %28 : vector<1x32xf32> to vector<256x32xf32>
      %30 = arith.addf %27, %29 : vector<256x32xf32>
      %cst_24 = arith.constant 0.000000e+00 : f32
      %31 = vector.broadcast %cst_24 : f32 to vector<256x32xf32>
      %32 = arith.maximumf %30, %31 : vector<256x32xf32>
      %c0_25 = arith.constant 0 : index
      %c0_26 = arith.constant 0 : index
      %33 = vector.load %arg8[%c0_25, %c0_26] : memref<32x128xf32, #tpu.memory_space<vmem>>, vector<32x128xf32>
      %cst_27 = arith.constant dense<0.000000e+00> : vector<256x128xf32>
      %34 = tpu.matmul %32, %33, %cst_27 {dimension_numbers = #tpu.dot_dimension_numbers<[1], [0], [0], [1], [0, 0, 1, 1], [], []>} : vector<256x32xf32>, vector<32x128xf32>, vector<256x128xf32> -> vector<256x128xf32>
      %c0_28 = arith.constant 0 : index
      %c0_29 = arith.constant 0 : index
      %35 = vector.load %arg9[%c0_28, %c0_29] : memref<1x128xf32, #tpu.memory_space<vmem>>, vector<1x128xf32>
      %36 = vector.broadcast %35 : vector<1x128xf32> to vector<256x128xf32>
      %37 = arith.addf %34, %36 : vector<256x128xf32>
      %c0_30 = arith.constant 0 : index
      %c0_31 = arith.constant 0 : index
      %38 = vector.load %arg10[%c0_30, %c0_31] : memref<256x128xf32, #tpu.memory_space<vmem>>, vector<256x128xf32>
      tpu.vector_store %arg10[%c0_30, %c0_31], %37 {strides = array<i32>} : memref<256x128xf32, #tpu.memory_space<vmem>>, vector<256x128xf32>,
    } else {
    }
    return
  }
  func.func @transform_0(%arg0: i32, %arg1: i32) -> (i32, i32) {
    %c0_i32 = arith.constant 0 : i32
    return %arg0, %arg1 : i32, i32
  }
  func.func @transform_1(%arg0: i32, %arg1: i32) -> (i32, i32) {
    %c0_i32 = arith.constant 0 : i32
    %c0_i32_0 = arith.constant 0 : i32
    return %arg1, %c0_i32 : i32, i32
  }
  func.func @transform_2(%arg0: i32, %arg1: i32) -> (i32, i32) {
    %c0_i32 = arith.constant 0 : i32
    %c0_i32_0 = arith.constant 0 : i32
    return %arg1, %c0_i32 : i32, i32
  }
  func.func @transform_3(%arg0: i32, %arg1: i32) -> (i32, i32) {
    %c0_i32 = arith.constant 0 : i32
    %c0_i32_0 = arith.constant 0 : i32
    %c0_i32_1 = arith.constant 0 : i32
    return %c0_i32, %c0_i32_0 : i32, i32
  }
  func.func @transform_4(%arg0: i32, %arg1: i32) -> (i32, i32) {
    %c0_i32 = arith.constant 0 : i32
    %c0_i32_0 = arith.constant 0 : i32
    %c0_i32_1 = arith.constant 0 : i32
    return %c0_i32, %c0_i32_0 : i32, i32
  }
  func.func @transform_5(%arg0: i32, %arg1: i32) -> (i32, i32) {
    %c0_i32 = arith.constant 0 : i32
    %c0_i32_0 = arith.constant 0 : i32
    %c0_i32_1 = arith.constant 0 : i32
    return %c0_i32, %c0_i32_0 : i32, i32
  }
  func.func @transform_6(%arg0: i32, %arg1: i32) -> (i32, i32) {
    %c0_i32 = arith.constant 0 : i32
    %c0_i32_0 = arith.constant 0 : i32
    %c0_i32_1 = arith.constant 0 : i32
    return %c0_i32, %c0_i32_0 : i32, i32
  }
  func.func @transform_7(%arg0: i32, %arg1: i32) -> (i32, i32) {
    %c0_i32 = arith.constant 0 : i32
    %c0_i32_0 = arith.constant 0 : i32
    %c0_i32_1 = arith.constant 0 : i32
    return %c0_i32, %c0_i32_0 : i32, i32
  }
  func.func @transform_8(%arg0: i32, %arg1: i32) -> (i32, i32) {
    %c0_i32 = arith.constant 0 : i32
    %c0_i32_0 = arith.constant 0 : i32
    return %arg0, %c0_i32 : i32, i32
  }
}

</mosaic_0001>

<bundles_post_ra>
// kernel: tile.1
= control target key start
LH: loop header
LB: loop body
LE: loop exit
PB: predicated region body
PF: predicated region fallthrough
CT: control target
= control target key end

     0   :  { %s20_s0 = inlined_call_operand.<no memory space> [shape: f32[], index: 0, kind: input, shape index: {}]   ;;  %s21_s1 = inlined_call_operand.vmem [shape: f32[1,128], index: 1, kind: output, shape index: {}]  }
   0x1   :  { %v2_v0 = vstv %s20_s0 }
   0x2   :  { %3 = vst [vmem:[%s21_s1] sm:$0x1] %v2_v0 }

// kernel: _lambda_.1
= control target key start
LH: loop header
LB: loop body
LE: loop exit
PB: predicated region body
PF: predicated region fallthrough
CT: control target
= control target key end

     0   :  { %s4104_s27 = smov 0   ;;  %s4106_s28 = smov 0   ;;  %s5023_s0 = inlined_call_operand.vmem [shape: bf16[512,512], index: 0, kind: input, shape index: {}]   ;;  %s5024_s1 = inlined_call_operand.vmem [shape: bf16[512,128], index: 1, kind: input, shape index: {}]   ;;  %s5025_s2 = inlined_call_operand.vmem [shape: bf16[512,128], index: 2, kind: input, shape index: {}]   ;;  %s5026_s3 = inlined_call_operand.vmem [shape: f32[1,128], index: 3, kind: input, shape index: {}]   ;;  %s5027_s4 = inlined_call_operand.vmem [shape: f32[128,32], index: 4, kind: input, shape index: {}]   ;;  %s5028_s5 = inlined_call_operand.vmem [shape: f32[1,32], index: 5, kind: input, shape index: {}]   ;;  %s5029_s6 = inlined_call_operand.vmem [shape: f32[32,128], index: 6, kind: input, shape index: {}]   ;;  %s5030_s7 = inlined_call_operand.vmem [shape: f32[1,128], index: 7, kind: input, shape index: {}]   ;;  %s5031_s8 = inlined_call_operand.vmem [shape: f32[512,128], index: 8, kind: output, shape index: {}]  }
   0x1   :  { %s4108_s29 = smov 0  }
   0x2 LB: > { %s30_s30 = sadd.s32 1, %s4053_s28  ;;  %p3011_p0 = scmp.ge.s32.totalorder %s4057_s29, 1  ;;  %s4057_s29 = sphi %s4108_s29, %s18_s29   ;;  %s4053_s28 = sphi %s4106_s28, %s5033_s28   ;;  %s4049_s27 = sphi %s4104_s27, %s5032_s27  }
   0x3   : > { %p32_p1 = scmp.ge.s32.totalorder %s30_s30, 2  ;;  %p305_p2 = scmp.lt.s32.totalorder %s4057_s29, 3 }
   0x5   : > { %s5035_s30 = smov (%p32_p1, %s30_s30), 0  ;;  %p306_p3 = pnand %p3011_p0, %p305_p2 }
   0x6   : > { %s3012_s23 = sshll.u32 (!%p306_p3), %s4049_s27, 5 }
   0x7   : > { %309 = sbr.rel (%p306_p3) target bundleno = 903 (0x387), region = 52  ;;  %p356_p4 = scmp.lt.s32.totalorder (!%p306_p3), %s3012_s23, 63 }
   0xc   : > { %v3875_v0 = vld [vmem:[%s5025_s2 + $0x78] sm:$0xff]   ;;  %v3879_v4 = vld [vmem:[%s5025_s2 + $0x70] sm:$0xff]   ;;  %v3883_v8 = vld [vmem:[%s5025_s2 + $0x68] sm:$0xff]   ;;  %s5037_s23 = smov (!%p356_p4, %s3012_s23), 63  ;;  %vm2550_vm0 = vcmask 261120  }
   0xd   : > { %v3876_v1 = vld [vmem:[%s5025_s2 + $0xf8] sm:$0xff]   ;;  %3183 = vmatprep.subr.bf16.mxu0 %v3875_v0  ;;  %v3880_v5 = vld [vmem:[%s5025_s2 + $0xf0] sm:$0xff]   ;;  %v3884_v9 = vld [vmem:[%s5025_s2 + $0xe8] sm:$0xff]   ;;  %s3182_s10 = sshll.u32 %s5037_s23, 4  ;;  %s3016_s9 = sshll.u32 %s5037_s23, 3 }
   0xe   : > { %v3877_v2 = vld [vmem:[%s5025_s2 + $0x38] sm:$0xff]   ;;  %3295 = vmatprep.subr.bf16.mxu1 %v3876_v1  ;;  %v3881_v6 = vld [vmem:[%s5025_s2 + $0x30] sm:$0xff]   ;;  %v3885_v10 = vld [vmem:[%s5025_s2 + $0x28] sm:$0xff]   ;;  %s4221_s18 = scalar_lea.vmem %s5023_s0, %s3182_s10  ;;  %s4948_s27 = scalar_lea.vmem %s5031_s8, %s3016_s9 }
   0xf   : > { %v3878_v3 = vld [vmem:[%s5025_s2 + $0xb8] sm:$0xff]   ;;  %3184 = vmatpush3.bf16.msra.mxu0 %v3877_v2  ;;  %v3882_v7 = vld [vmem:[%s5025_s2 + $0xb0] sm:$0xff]   ;;  %v3886_v11 = vld [vmem:[%s5025_s2 + $0xa8] sm:$0xff]  }
  0x10   : > { %3296 = vmatpush3.bf16.msra.mxu1 %v3878_v3  ;;  %3185 = vmatprep.subr.bf16.mxu0 %v3879_v4  ;;  %v3887_v12 = vld [vmem:[%s5025_s2 + $0x60] sm:$0xff]   ;;  %v3891_v16 = vld [vmem:[%s5025_s2 + $0x58] sm:$0xff]   ;;  %v3895_v20 = vld [vmem:[%s5025_s2 + $0x50] sm:$0xff]  }
  0x11   : > { %3297 = vmatprep.subr.bf16.mxu1 %v3880_v5  ;;  %v3888_v13 = vld [vmem:[%s5025_s2 + $0xe0] sm:$0xff]   ;;  %v3892_v17 = vld [vmem:[%s5025_s2 + $0xd8] sm:$0xff]   ;;  %v3896_v21 = vld [vmem:[%s5025_s2 + $0xd0] sm:$0xff]  }
  0x12   : > { %v3889_v14 = vld [vmem:[%s5025_s2 + $0x20] sm:$0xff]   ;;  %v3893_v18 = vld [vmem:[%s5025_s2 + $0x18] sm:$0xff]   ;;  %v3897_v22 = vld [vmem:[%s5025_s2 + $0x10] sm:$0xff]  }
  0x13   : > { %3186 = vmatpush3.bf16.msra.mxu0 %v3881_v6  ;;  %v3890_v15 = vld [vmem:[%s5025_s2 + $0xa0] sm:$0xff]   ;;  %v3894_v19 = vld [vmem:[%s5025_s2 + $0x98] sm:$0xff]   ;;  %v3898_v23 = vld [vmem:[%s5025_s2 + $0x90] sm:$0xff]  }
  0x14   : > { %3298 = vmatpush3.bf16.msra.mxu1 %v3882_v7  ;;  %3187 = vmatprep.subr.bf16.mxu0 %v3883_v8  ;;  %v3899_v24 = vld [vmem:[%s5025_s2 + $0x48] sm:$0xff]   ;;  %v3903_v28 = vld [vmem:[%s5025_s2 + $0x40] sm:$0xff]   ;;  %v3913_v36 = vld [vmem:[%s5024_s1 + $0x78] sm:$0xff]  }
  0x15   : > { %3299 = vmatprep.subr.bf16.mxu1 %v3884_v9  ;;  %v3900_v25 = vld [vmem:[%s5025_s2 + $0xc8] sm:$0xff]   ;;  %v3904_v29 = vld [vmem:[%s5025_s2 + $0xc0] sm:$0xff]   ;;  %v3914_v37 = vld [vmem:[%s5024_s1 + $0x38] sm:$0xff]  }
  0x16   : > { %v3901_v26 = vld [vmem:[%s5025_s2 + $0x8] sm:$0xff]   ;;  %v3905_v30 = vld [vmem:[%s5025_s2] sm:$0xff]   ;;  %v3915_v38 = vld [vmem:[%s5024_s1 + $0xf8] sm:$0xff]  }
  0x17   : > { %3188 = vmatpush3.bf16.msra.mxu0 %v3885_v10  ;;  %v3902_v27 = vld [vmem:[%s5025_s2 + $0x88] sm:$0xff]   ;;  %v3906_v31 = vld [vmem:[%s5025_s2 + $0x80] sm:$0xff]   ;;  %v3916_v39 = vld [vmem:[%s5024_s1 + $0xb8] sm:$0xff]  }
  0x18   : > { %3300 = vmatpush3.bf16.msra.mxu1 %v3886_v11  ;;  %3189 = vmatprep.subr.bf16.mxu0 %v3887_v12  ;;  %v4230_v32 = vld [vmem:[%s4221_s18] ss:$16 sps:$4 sm:$0xff]   ;;  %v4233_v33 = vld [vmem:[%s4221_s18 + $0x4] ss:$16 sps:$4 sm:$0xff]   ;;  %v4236_v34 = vld [vmem:[%s4221_s18 + $0x8] ss:$16 sps:$4 sm:$0xff]  }
  0x19   : > { %3301 = vmatprep.subr.bf16.mxu1 %v3888_v13  ;;  %v4239_v35 = vld [vmem:[%s4221_s18 + $0xc] ss:$16 sps:$4 sm:$0xff]   ;;  %1189 = vmatprep.mubr.bf16.mxu0 %v4233_v33  ;;  %v4258_v40 = vld [vmem:[%s4221_s18 + $0x24] ss:$16 sps:$4 sm:$0xff]   ;;  %v4264_v42 = vld [vmem:[%s4221_s18 + $0x20] ss:$16 sps:$4 sm:$0xff]  }
  0x1a   : > { %1350 = vmatprep.mubr.bf16.mxu1 %v4239_v35  ;;  %v4261_v41 = vld [vmem:[%s4221_s18 + $0x2c] ss:$16 sps:$4 sm:$0xff]   ;;  %v4268_v43 = vld [vmem:[%s4221_s18 + $0x28] ss:$16 sps:$4 sm:$0xff]   ;;  %v4272_v44 = vld [vmem:[%s4221_s18 + $0x44] ss:$16 sps:$4 sm:$0xff]  }
  0x1b   : > { %3190 = vmatpush3.bf16.msra.mxu0 %v3889_v14  ;;  %v4275_v45 = vld [vmem:[%s4221_s18 + $0x4c] ss:$16 sps:$4 sm:$0xff]   ;;  %v3929_v46 = vld [vmem:[%s5024_s1 + $0x70] sm:$0xff]   ;;  %v4297_v51 = vld [vmem:[%s4221_s18 + $0x48] ss:$16 sps:$4 sm:$0xff]  }
  0x1c   : > { %3302 = vmatpush3.bf16.msra.mxu1 %v3890_v15  ;;  %3191 = vmatprep.subr.bf16.mxu0 %v3891_v16  ;;  %v3930_v47 = vld [vmem:[%s5024_s1 + $0x30] sm:$0xff]   ;;  %v4303_v53 = vld [vmem:[%s4221_s18 + $0x6c] ss:$16 sps:$4 sm:$0xff]   ;;  %v4316_v56 = vld [vmem:[%s4221_s18 + $0x68] ss:$16 sps:$4 sm:$0xff]  }
  0x1d   : > { %3303 = vmatprep.subr.bf16.mxu1 %v3892_v17  ;;  %v4288_v48 = vld [vmem:[%s4221_s18 + $0x40] ss:$16 sps:$4 sm:$0xff]   ;;  %v4300_v52 = vld [vmem:[%s4221_s18 + $0x64] ss:$16 sps:$4 sm:$0xff]   ;;  %v3945_v55 = vld [vmem:[%s5024_s1 + $0x68] sm:$0xff]  }
  0x1e   : > { %v3931_v49 = vld [vmem:[%s5024_s1 + $0xf0] sm:$0xff]   ;;  %v3946_v58 = vld [vmem:[%s5024_s1 + $0x28] sm:$0xff]   ;;  %v3961_v1 = vld [vmem:[%s5024_s1 + $0x60] sm:$0xff]  }
  0x1f   : > { %3192 = vmatpush3.bf16.msra.mxu0 %v3893_v18  ;;  %v3932_v50 = vld [vmem:[%s5024_s1 + $0xb0] sm:$0xff]   ;;  %v3947_v59 = vld [vmem:[%s5024_s1 + $0xe8] sm:$0xff]   ;;  %v3962_v3 = vld [vmem:[%s5024_s1 + $0x20] sm:$0xff]  }
  0x20   : > { %3304 = vmatpush3.bf16.msra.mxu1 %v3894_v19  ;;  %3193 = vmatprep.subr.bf16.mxu0 %v3895_v20  ;;  %v4310_v54 = vld [vmem:[%s4221_s18 + $0x60] ss:$16 sps:$4 sm:$0xff]   ;;  %v4319_v57 = vld [vmem:[%s4221_s18 + $0x84] ss:$16 sps:$4 sm:$0xff]   ;;  %v3948_v60 = vld [vmem:[%s5024_s1 + $0xa8] sm:$0xff]  }
  0x21   : > { %3305 = vmatprep.subr.bf16.mxu1 %v3896_v21  ;;  %v4331_v61 = vld [vmem:[%s4221_s18 + $0x8c] ss:$16 sps:$4 sm:$0xff]   ;;  %v4338_v62 = vld [vmem:[%s4221_s18 + $0x80] ss:$16 sps:$4 sm:$0xff]   ;;  %v4341_v63 = vld [vmem:[%s4221_s18 + $0x88] ss:$16 sps:$4 sm:$0xff]  }
  0x22   : > { %v4344_v0 = vld [vmem:[%s4221_s18 + $0xa4] ss:$16 sps:$4 sm:$0xff]   ;;  %v4350_v2 = vld [vmem:[%s4221_s18 + $0xac] ss:$16 sps:$4 sm:$0xff]   ;;  %v4366_v6 = vld [vmem:[%s4221_s18 + $0xa0] ss:$16 sps:$4 sm:$0xff]  }
  0x23   : > { %3194 = vmatpush3.bf16.msra.mxu0 %v3897_v22  ;;  %v3963_v4 = vld [vmem:[%s5024_s1 + $0xe0] sm:$0xff]   ;;  %v4369_v7 = vld [vmem:[%s4221_s18 + $0xa8] ss:$16 sps:$4 sm:$0xff]   ;;  %v4375_v9 = vld [vmem:[%s4221_s18 + $0xcc] ss:$16 sps:$4 sm:$0xff]  }
  0x24   : > { %3306 = vmatpush3.bf16.msra.mxu1 %v3898_v23  ;;  %3195 = vmatprep.subr.bf16.mxu0 %v3899_v24  ;;  %v3964_v5 = vld [vmem:[%s5024_s1 + $0xa0] sm:$0xff]   ;;  %v3977_v10 = vld [vmem:[%s5024_s1 + $0x58] sm:$0xff]   ;;  %v3993_v18 = vld [vmem:[%s5024_s1 + $0x50] sm:$0xff]  }
  0x25   : > { %3307 = vmatprep.subr.bf16.mxu1 %v3900_v25  ;;  %v4372_v8 = vld [vmem:[%s4221_s18 + $0xc4] ss:$16 sps:$4 sm:$0xff]   ;;  %v3978_v11 = vld [vmem:[%s5024_s1 + $0x18] sm:$0xff]   ;;  %v4394_v14 = vld [vmem:[%s4221_s18 + $0xc0] ss:$16 sps:$4 sm:$0xff]  }
  0x26   : > { %v3979_v12 = vld [vmem:[%s5024_s1 + $0xd8] sm:$0xff]   ;;  %v4400_v16 = vld [vmem:[%s4221_s18 + $0xe4] ss:$16 sps:$4 sm:$0xff]   ;;  %v4422_v22 = vld [vmem:[%s4221_s18 + $0xe0] ss:$16 sps:$4 sm:$0xff]  }
  0x27   : > { %3196 = vmatpush3.bf16.msra.mxu0 %v3901_v26  ;;  %v3980_v13 = vld [vmem:[%s5024_s1 + $0x98] sm:$0xff]   ;;  %v3994_v19 = vld [vmem:[%s5024_s1 + $0x10] sm:$0xff]   ;;  %v4009_v26 = vld [vmem:[%s5024_s1 + $0x48] sm:$0xff]  }
  0x28   : > { %3308 = vmatpush3.bf16.msra.mxu1 %v3902_v27  ;;  %3197 = vmatprep.subr.bf16.mxu0 %v3903_v28  ;;  %v4397_v15 = vld [vmem:[%s4221_s18 + $0xc8] ss:$16 sps:$4 sm:$0xff]   ;;  %v4403_v17 = vld [vmem:[%s4221_s18 + $0xec] ss:$16 sps:$4 sm:$0xff]   ;;  %v3995_v20 = vld [vmem:[%s5024_s1 + $0xd0] sm:$0xff]  }
  0x29   : > { %3309 = vmatprep.subr.bf16.mxu1 %v3904_v29  ;;  %v3996_v21 = vld [vmem:[%s5024_s1 + $0x90] sm:$0xff]   ;;  %v4425_v23 = vld [vmem:[%s4221_s18 + $0xe8] ss:$16 sps:$4 sm:$0xff]   ;;  %v4431_v25 = vld [vmem:[%s4221_s18 + $0x10c] ss:$16 sps:$4 sm:$0xff]  }
  0x2a   : > { %v4428_v24 = vld [vmem:[%s4221_s18 + $0x104] ss:$16 sps:$4 sm:$0xff]   ;;  %v4010_v27 = vld [vmem:[%s5024_s1 + $0x8] sm:$0xff]  }
  0x2b   : > { %3198 = vmatpush3.bf16.msra.mxu0 %v3905_v30  ;;  %v4011_v28 = vld [vmem:[%s5024_s1 + $0xc8] sm:$0xff]   ;;  %v4450_v30 = vld [vmem:[%s4221_s18 + $0x100] ss:$16 sps:$4 sm:$0xff]  }
  0x2c   : > { %3310 = vmatpush3.bf16.msra.mxu1 %v3906_v31  ;;  %3407 = vmatprep.subr.bf16.mxu0 %v3913_v36  ;;  %v4012_v29 = vld [vmem:[%s5024_s1 + $0x88] sm:$0xff]   ;;  %v4456_v36 = vld [vmem:[%s4221_s18 + $0x124] ss:$16 sps:$4 sm:$0xff]  }
  0x2d   : > { %3519 = vmatprep.subr.bf16.mxu1 %v3915_v38  ;;  %v4453_v31 = vld [vmem:[%s4221_s18 + $0x108] ss:$16 sps:$4 sm:$0xff]   ;;  %v4025_v38 = vld [vmem:[%s5024_s1 + $0x40] sm:$0xff]  }
  0x2e   : > { %1190 = vmatmul.mubr.bf16.vlgmr.msra.gmra.mxu0 %v4230_v32 }
  0x2f   : > { %1351 = vmatmul.mubr.bf16.vlgmr.msra.gmra.mxu1 %v4236_v34  ;;  %3408 = vmatpush3.bf16.msra.mxu0 %v3914_v37  ;;  %v4459_v37 = vld [vmem:[%s4221_s18 + $0x12c] ss:$16 sps:$4 sm:$0xff]  }
  0x30   : > { %3520 = vmatpush3.bf16.msra.mxu1 %v3916_v39  ;;  %1197 = vmatprep.mubr.bf16.mxu0 %v4258_v40  ;;  %v4026_v39 = vld [vmem:[%s5024_s1] sm:$0xff]  }
  0x31   : > { %1358 = vmatprep.mubr.bf16.mxu1 %v4261_v41  ;;  %3409 = vmatprep.subr.bf16.mxu0 %v3929_v46  ;;  %v4472_v46 = vld [vmem:[%s4221_s18 + $0x120] ss:$16 sps:$4 sm:$0xff]  }
  0x32   : > { %3521 = vmatprep.subr.bf16.mxu1 %v3931_v49  ;;  %v4028_v49 = vld [vmem:[%s5024_s1 + $0x80] sm:$0xff]  }
  0x33   : > { %3410 = vmatpush3.bf16.msra.mxu0 %v3930_v47  ;;  %v4027_v47 = vld [vmem:[%s5024_s1 + $0xc0] sm:$0xff]  }
  0x34   : > { %3522 = vmatpush3.bf16.msra.mxu1 %v3932_v50  ;;  %3411 = vmatprep.subr.bf16.mxu0 %v3945_v55  ;;  %v4481_v50 = vld [vmem:[%s4221_s18 + $0x128] ss:$16 sps:$4 sm:$0xff]   ;;  %v4484_v55 = vld [vmem:[%s4221_s18 + $0x144] ss:$16 sps:$4 sm:$0xff]  }
  0x35   : > { %3523 = vmatprep.subr.bf16.mxu1 %v3947_v59  ;;  %v4494_v59 = vld [vmem:[%s4221_s18 + $0x140] ss:$16 sps:$4 sm:$0xff]  }
  0x36   : > { %1198 = vmatmul.mubr.bf16.gmra.mxu0 %v4264_v42 }
  0x37   : > { %1359 = vmatmul.mubr.bf16.gmra.mxu1 %v4268_v43  ;;  %1205 = vmatprep.mubr.bf16.mxu0 %v4272_v44 }
  0x38   : > { %1366 = vmatprep.mubr.bf16.mxu1 %v4275_v45  ;;  %3412 = vmatpush3.bf16.msra.mxu0 %v3946_v58  ;;  %v4487_v58 = vld [vmem:[%s4221_s18 + $0x14c] ss:$16 sps:$4 sm:$0xff]  }
  0x39   : > { %3524 = vmatpush3.bf16.msra.mxu1 %v3948_v60  ;;  %3413 = vmatprep.subr.bf16.mxu0 %v3961_v1  ;;  %v4497_v60 = vld [vmem:[%s4221_s18 + $0x148] ss:$16 sps:$4 sm:$0xff]   ;;  %v4500_v1 = vld [vmem:[%s4221_s18 + $0x164] ss:$16 sps:$4 sm:$0xff]  }
  0x3a   : > { %3525 = vmatprep.subr.bf16.mxu1 %v3963_v4  ;;  %v4510_v4 = vld [vmem:[%s4221_s18 + $0x160] ss:$16 sps:$4 sm:$0xff]  }
  0x3c   : > { %3414 = vmatpush3.bf16.msra.mxu0 %v3962_v3  ;;  %v4503_v3 = vld [vmem:[%s4221_s18 + $0x16c] ss:$16 sps:$4 sm:$0xff]  }
  0x3d   : > { %3526 = vmatpush3.bf16.msra.mxu1 %v3964_v5  ;;  %3415 = vmatprep.subr.bf16.mxu0 %v3977_v10  ;;  %v4513_v5 = vld [vmem:[%s4221_s18 + $0x168] ss:$16 sps:$4 sm:$0xff]   ;;  %v4516_v10 = vld [vmem:[%s4221_s18 + $0x184] ss:$16 sps:$4 sm:$0xff]  }
  0x3e   : > { %1206 = vmatmul.mubr.bf16.gmra.mxu0 %v4288_v48  ;;  %3527 = vmatprep.subr.bf16.mxu1 %v3979_v12  ;;  %v4526_v12 = vld [vmem:[%s4221_s18 + $0x180] ss:$16 sps:$4 sm:$0xff]  }
  0x3f   : > { %1367 = vmatmul.mubr.bf16.gmra.mxu1 %v4297_v51  ;;  %1213 = vmatprep.mubr.bf16.mxu0 %v4300_v52 }
  0x40   : > { %1374 = vmatprep.mubr.bf16.mxu1 %v4303_v53  ;;  %3416 = vmatpush3.bf16.msra.mxu0 %v3978_v11  ;;  %v4519_v11 = vld [vmem:[%s4221_s18 + $0x18c] ss:$16 sps:$4 sm:$0xff]  }
  0x41   : > { %3528 = vmatpush3.bf16.msra.mxu1 %v3980_v13  ;;  %3417 = vmatprep.subr.bf16.mxu0 %v3993_v18  ;;  %v4529_v13 = vld [vmem:[%s4221_s18 + $0x188] ss:$16 sps:$4 sm:$0xff]   ;;  %v4532_v18 = vld [vmem:[%s4221_s18 + $0x1a4] ss:$16 sps:$4 sm:$0xff]  }
  0x42   : > { %3529 = vmatprep.subr.bf16.mxu1 %v3995_v20  ;;  %v4542_v20 = vld [vmem:[%s4221_s18 + $0x1a0] ss:$16 sps:$4 sm:$0xff]  }
  0x44   : > { %3418 = vmatpush3.bf16.msra.mxu0 %v3994_v19  ;;  %v4535_v19 = vld [vmem:[%s4221_s18 + $0x1ac] ss:$16 sps:$4 sm:$0xff]  }
  0x45   : > { %3530 = vmatpush3.bf16.msra.mxu1 %v3996_v21  ;;  %3419 = vmatprep.subr.bf16.mxu0 %v4009_v26  ;;  %v4545_v21 = vld [vmem:[%s4221_s18 + $0x1a8] ss:$16 sps:$4 sm:$0xff]   ;;  %v4548_v26 = vld [vmem:[%s4221_s18 + $0x1c4] ss:$16 sps:$4 sm:$0xff]  }
  0x46   : > { %1214 = vmatmul.mubr.bf16.gmra.mxu0 %v4310_v54  ;;  %3531 = vmatprep.subr.bf16.mxu1 %v4011_v28  ;;  %v4558_v28 = vld [vmem:[%s4221_s18 + $0x1c0] ss:$16 sps:$4 sm:$0xff]  }
  0x47   : > { %1375 = vmatmul.mubr.bf16.gmra.mxu1 %v4316_v56  ;;  %1221 = vmatprep.mubr.bf16.mxu0 %v4319_v57 }
  0x48   : > { %1382 = vmatprep.mubr.bf16.mxu1 %v4331_v61  ;;  %3420 = vmatpush3.bf16.msra.mxu0 %v4010_v27  ;;  %v4551_v27 = vld [vmem:[%s4221_s18 + $0x1cc] ss:$16 sps:$4 sm:$0xff]  }
  0x49   : > { %3532 = vmatpush3.bf16.msra.mxu1 %v4012_v29  ;;  %3421 = vmatprep.subr.bf16.mxu0 %v4025_v38  ;;  %v4561_v29 = vld [vmem:[%s4221_s18 + $0x1c8] ss:$16 sps:$4 sm:$0xff]   ;;  %v4564_v38 = vld [vmem:[%s4221_s18 + $0x1e4] ss:$16 sps:$4 sm:$0xff]  }
  0x4a   : > { %3533 = vmatprep.subr.bf16.mxu1 %v4027_v47  ;;  %v4574_v47 = vld [vmem:[%s4221_s18 + $0x1e0] ss:$16 sps:$4 sm:$0xff]  }
  0x4c   : > { %3422 = vmatpush3.bf16.msra.mxu0 %v4026_v39  ;;  %v4567_v39 = vld [vmem:[%s4221_s18 + $0x1ec] ss:$16 sps:$4 sm:$0xff]  }
  0x4d   : > { %3534 = vmatpush3.bf16.msra.mxu1 %v4028_v49  ;;  %v4577_v49 = vld [vmem:[%s4221_s18 + $0x1e8] ss:$16 sps:$4 sm:$0xff]  }
  0x4e   : > { %1222 = vmatmul.mubr.bf16.gmra.mxu0 %v4338_v62 }
  0x4f   : > { %1383 = vmatmul.mubr.bf16.gmra.mxu1 %v4341_v63  ;;  %1229 = vmatprep.mubr.bf16.mxu0 %v4344_v0 }
  0x50   : > { %1390 = vmatprep.mubr.bf16.mxu1 %v4350_v2 }
  0x56   : > { %1230 = vmatmul.mubr.bf16.gmra.mxu0 %v4366_v6 }
  0x57   : > { %1391 = vmatmul.mubr.bf16.gmra.mxu1 %v4369_v7  ;;  %1237 = vmatprep.mubr.bf16.mxu0 %v4372_v8 }
  0x58   : > { %1398 = vmatprep.mubr.bf16.mxu1 %v4375_v9 }
  0x5e   : > { %1238 = vmatmul.mubr.bf16.gmra.mxu0 %v4394_v14 }
  0x5f   : > { %1399 = vmatmul.mubr.bf16.gmra.mxu1 %v4397_v15  ;;  %1245 = vmatprep.mubr.bf16.mxu0 %v4400_v16 }
  0x60   : > { %1406 = vmatprep.mubr.bf16.mxu1 %v4403_v17 }
  0x66   : > { %1246 = vmatmul.mubr.bf16.gmra.mxu0 %v4422_v22 }
  0x67   : > { %1407 = vmatmul.mubr.bf16.gmra.mxu1 %v4425_v23  ;;  %1253 = vmatprep.mubr.bf16.mxu0 %v4428_v24 }
  0x68   : > { %1414 = vmatprep.mubr.bf16.mxu1 %v4431_v25 }
  0x6e   : > { %1254 = vmatmul.mubr.bf16.gmra.mxu0 %v4450_v30 }
  0x6f   : > { %1415 = vmatmul.mubr.bf16.gmra.mxu1 %v4453_v31  ;;  %1261 = vmatprep.mubr.bf16.mxu0 %v4456_v36 }
  0x70   : > { %1422 = vmatprep.mubr.bf16.mxu1 %v4459_v37 }
  0x76   : > { %1262 = vmatmul.mubr.bf16.gmra.mxu0 %v4472_v46 }
  0x77   : > { %1423 = vmatmul.mubr.bf16.gmra.mxu1 %v4481_v50  ;;  %1269 = vmatprep.mubr.bf16.mxu0 %v4484_v55 }
  0x78   : > { %1430 = vmatprep.mubr.bf16.mxu1 %v4487_v58 }
  0x7e   : > { %1270 = vmatmul.mubr.bf16.gmra.mxu0 %v4494_v59 }
  0x7f   : > { %1431 = vmatmul.mubr.bf16.gmra.mxu1 %v4497_v60  ;;  %1277 = vmatprep.mubr.bf16.mxu0 %v4500_v1 }
  0x80   : > { %1438 = vmatprep.mubr.bf16.mxu1 %v4503_v3 }
  0x86   : > { %1278 = vmatmul.mubr.bf16.gmra.mxu0 %v4510_v4 }
  0x87   : > { %1439 = vmatmul.mubr.bf16.gmra.mxu1 %v4513_v5  ;;  %1285 = vmatprep.mubr.bf16.mxu0 %v4516_v10 }
  0x88   : > { %1446 = vmatprep.mubr.bf16.mxu1 %v4519_v11 }
  0x8e   : > { %1286 = vmatmul.mubr.bf16.gmra.mxu0 %v4526_v12 }
  0x8f   : > { %1447 = vmatmul.mubr.bf16.gmra.mxu1 %v4529_v13  ;;  %1293 = vmatprep.mubr.bf16.mxu0 %v4532_v18 }
  0x90   : > { %1454 = vmatprep.mubr.bf16.mxu1 %v4535_v19 }
  0x96   : > { %1294 = vmatmul.mubr.bf16.gmra.mxu0 %v4542_v20 }
  0x97   : > { %1455 = vmatmul.mubr.bf16.gmra.mxu1 %v4545_v21  ;;  %1301 = vmatprep.mubr.bf16.mxu0 %v4548_v26 }
  0x98   : > { %1462 = vmatprep.mubr.bf16.mxu1 %v4551_v27 }
  0x9e   : > { %1302 = vmatmul.mubr.bf16.gmra.mxu0 %v4558_v28 }
  0x9f   : > { %1463 = vmatmul.mubr.bf16.gmra.mxu1 %v4561_v29  ;;  %1309 = vmatprep.mubr.bf16.mxu0 %v4564_v38 }
  0xa0   : > { %1470 = vmatprep.mubr.bf16.mxu1 %v4567_v39 }
  0xa6   : > { %1310 = vmatmul.mubr.bf16.gmra.mxu0 %v4574_v47 }
  0xa7   : > { %1471 = vmatmul.mubr.bf16.gmra.mxu1 %v4577_v49  ;;  %1703 = vmatprep.mubr.bf16.mxu0 %v4233_v33  ;;  %v2273_v33 = vld [vmem:[%s5027_s4 + $0x70] sm:$0xff] }
  0xa8   : > { %1864 = vmatprep.mubr.bf16.mxu1 %v4239_v35  ;;  %v2271_v35 = vld [vmem:[%s5027_s4 + $0x60] sm:$0xff] }
  0xae   : > { %1704 = vmatmul.mubr.bf16.vlgmr.msra.gmra.mxu0 %v4230_v32  ;;  %v2274_v32 = vld [vmem:[%s5027_s4 + $0x78] sm:$0xff] }
  0xaf   : > { %1865 = vmatmul.mubr.bf16.vlgmr.msra.gmra.mxu1 %v4236_v34  ;;  %1711 = vmatprep.mubr.bf16.mxu0 %v4258_v40  ;;  %v2272_v34 = vld [vmem:[%s5027_s4 + $0x68] sm:$0xff]  ;;  %v2270_v40 = vld [vmem:[%s5027_s4 + $0x58] sm:$0xff] }
  0xb0   : > { %1872 = vmatprep.mubr.bf16.mxu1 %v4261_v41  ;;  %3715 = vmatprep.subr.mxu0 %v2274_v32  ;;  %v2269_v41 = vld [vmem:[%s5027_s4 + $0x50] sm:$0xff] }
  0xb1   : > { %3716 = vmatpush3.msra.mxu0 %v2274_v32 }
  0xb2   : > { %3717 = vmatprep.subr.mxu0 %v2273_v33 }
  0xb3   : > { %3718 = vmatpush3.msra.mxu0 %v2273_v33 }
  0xb4   : > { %3719 = vmatprep.subr.mxu0 %v2272_v34 }
  0xb5   : > { %3720 = vmatpush3.msra.mxu0 %v2272_v34 }
  0xb6   : > { %1712 = vmatmul.mubr.bf16.gmra.mxu0 %v4264_v42  ;;  %3721 = vmatprep.subr.mxu0 %v2271_v35  ;;  %v2268_v42 = vld [vmem:[%s5027_s4 + $0x48] sm:$0xff] }
  0xb7   : > { %1873 = vmatmul.mubr.bf16.gmra.mxu1 %v4268_v43  ;;  %1719 = vmatprep.mubr.bf16.mxu0 %v4272_v44 }
  0xb8   : > { %1880 = vmatprep.mubr.bf16.mxu1 %v4275_v45  ;;  %3722 = vmatpush3.msra.mxu0 %v2271_v35  ;;  %v2267_v45 = vld [vmem:[%s5027_s4 + $0x40] sm:$0xff]  ;;  %v2260_v35 = vld [vmem:[%s5027_s4 + $0x8] sm:$0xff] }
  0xb9   : > { %3723 = vmatprep.subr.mxu0 %v2270_v40 }
  0xba   : > { %3724 = vmatpush3.msra.mxu0 %v2270_v40 }
  0xbb   : > { %3725 = vmatprep.subr.mxu0 %v2269_v41 }
  0xbc   : > { %3726 = vmatpush3.msra.mxu0 %v2269_v41 }
  0xbd   : > { %3727 = vmatprep.subr.mxu0 %v2268_v42 }
  0xbe   : > { %1720 = vmatmul.mubr.bf16.gmra.mxu0 %v4288_v48 }
  0xbf   : > { %1881 = vmatmul.mubr.bf16.gmra.mxu1 %v4297_v51  ;;  %1727 = vmatprep.mubr.bf16.mxu0 %v4300_v52 }
  0xc0   : > { %1888 = vmatprep.mubr.bf16.mxu1 %v4303_v53  ;;  %3728 = vmatpush3.msra.mxu0 %v2268_v42  ;;  %v2266_v53 = vld [vmem:[%s5027_s4 + $0x38] sm:$0xff] }
  0xc1   : > { %3729 = vmatprep.subr.mxu0 %v2267_v45 }
  0xc2   : > { %3730 = vmatpush3.msra.mxu0 %v2267_v45 }
  0xc3   : > { %3731 = vmatprep.subr.mxu0 %v2266_v53 }
  0xc4   : > { %3732 = vmatpush3.msra.mxu0 %v2266_v53 }
  0xc6   : > { %1728 = vmatmul.mubr.bf16.gmra.mxu0 %v4310_v54 }
  0xc7   : > { %1889 = vmatmul.mubr.bf16.gmra.mxu1 %v4316_v56  ;;  %1735 = vmatprep.mubr.bf16.mxu0 %v4319_v57 }
  0xc8   : > { %1896 = vmatprep.mubr.bf16.mxu1 %v4331_v61  ;;  %v2265_v61 = vld [vmem:[%s5027_s4 + $0x30] sm:$0xff] }
  0xc9   : > { %3733 = vmatprep.subr.mxu0 %v2265_v61 }
  0xca   : > { %3734 = vmatpush3.msra.mxu0 %v2265_v61 }
  0xce   : > { %1736 = vmatmul.mubr.bf16.gmra.mxu0 %v4338_v62 }
  0xcf   : > { %1897 = vmatmul.mubr.bf16.gmra.mxu1 %v4341_v63  ;;  %1743 = vmatprep.mubr.bf16.mxu0 %v4344_v0 }
  0xd0   : > { %1904 = vmatprep.mubr.bf16.mxu1 %v4350_v2 }
  0xd6   : > { %1744 = vmatmul.mubr.bf16.gmra.mxu0 %v4366_v6 }
  0xd7   : > { %1905 = vmatmul.mubr.bf16.gmra.mxu1 %v4369_v7  ;;  %1751 = vmatprep.mubr.bf16.mxu0 %v4372_v8  ;;  %v2264_v8 = vld [vmem:[%s5027_s4 + $0x28] sm:$0xff] }
  0xd8   : > { %1912 = vmatprep.mubr.bf16.mxu1 %v4375_v9  ;;  %3735 = vmatprep.subr.mxu0 %v2264_v8 }
  0xd9   : > { %3736 = vmatpush3.msra.mxu0 %v2264_v8 }
  0xde   : > { %1752 = vmatmul.mubr.bf16.gmra.mxu0 %v4394_v14 }
  0xdf   : > { %1913 = vmatmul.mubr.bf16.gmra.mxu1 %v4397_v15  ;;  %1759 = vmatprep.mubr.bf16.mxu0 %v4400_v16  ;;  %v2263_v16 = vld [vmem:[%s5027_s4 + $0x20] sm:$0xff] }
  0xe0   : > { %1920 = vmatprep.mubr.bf16.mxu1 %v4403_v17  ;;  %3737 = vmatprep.subr.mxu0 %v2263_v16 }
  0xe1   : > { %3738 = vmatpush3.msra.mxu0 %v2263_v16 }
  0xe6   : > { %1760 = vmatmul.mubr.bf16.gmra.mxu0 %v4422_v22 }
  0xe7   : > { %1921 = vmatmul.mubr.bf16.gmra.mxu1 %v4425_v23  ;;  %1767 = vmatprep.mubr.bf16.mxu0 %v4428_v24 }
  0xe8   : > { %1928 = vmatprep.mubr.bf16.mxu1 %v4431_v25  ;;  %v2262_v25 = vld [vmem:[%s5027_s4 + $0x18] sm:$0xff] }
  0xe9   : > { %3739 = vmatprep.subr.mxu0 %v2262_v25 }
  0xea   : > { %3740 = vmatpush3.msra.mxu0 %v2262_v25 }
  0xee   : > { %v3199_v43 = vpop.f32.mrf.mxu0  ;;  %1768 = vmatmul.mubr.bf16.gmra.mxu0 %v4450_v30 }
  0xef   : > { %v3311_v44 = vpop.f32.mrf.mxu1  ;;  %1929 = vmatmul.mubr.bf16.gmra.mxu1 %v4453_v31  ;;  %1775 = vmatprep.mubr.bf16.mxu0 %v4456_v36 }
  0xf0   : > { %v3200_v48 = vpop.f32.mrf.mxu0  ;;  %1936 = vmatprep.mubr.bf16.mxu1 %v4459_v37 }
  0xf1   : > { %v3201_v51 = vadd.f32 %v3200_v48, %v3199_v43  ;;  %v3312_v52 = vpop.f32.mrf.mxu1 }
  0xf2   : > { %v3313_v54 = vadd.f32 %v3312_v52, %v3311_v44  ;;  %v3202_v56 = vpop.f32.mrf.mxu0 }
  0xf3   : > { %v3314_v57 = vpop.f32.mrf.mxu1 }
  0xf4   : > { %v4649_v62 = vadd.f32 %v3313_v54, %v3201_v51  ;;  %v3203_v63 = vpop.f32.mrf.mxu0 }
  0xf5   : > { %v3204_v0 = vadd.f32 %v3203_v63, %v3202_v56  ;;  %v3315_v2 = vpop.f32.mrf.mxu1 }
  0xf6   : > { %v3316_v6 = vadd.f32 %v3315_v2, %v3314_v57  ;;  %v3205_v7 = vpop.f32.mrf.mxu0  ;;  %1776 = vmatmul.mubr.bf16.gmra.mxu0 %v4472_v46 }
  0xf7   : > { %v3317_v9 = vpop.f32.mrf.mxu1  ;;  %1937 = vmatmul.mubr.bf16.gmra.mxu1 %v4481_v50  ;;  %1783 = vmatprep.mubr.bf16.mxu0 %v4484_v55 }
  0xf8   : > { %v4657_v14 = vadd.f32 %v3316_v6, %v3204_v0  ;;  %v3206_v15 = vpop.f32.mrf.mxu0  ;;  %1944 = vmatprep.mubr.bf16.mxu1 %v4487_v58  ;;  %v2261_v58 = vld [vmem:[%s5027_s4 + $0x10] sm:$0xff] }
  0xf9   : > { %v3207_v17 = vadd.f32 %v3206_v15, %v3205_v7  ;;  %v3318_v22 = vpop.f32.mrf.mxu1  ;;  %3741 = vmatprep.subr.mxu0 %v2261_v58 }
  0xfa   : > { %v3319_v23 = vadd.f32 %v3318_v22, %v3317_v9  ;;  %v3208_v24 = vpop.f32.mrf.mxu0  ;;  %3742 = vmatpush3.msra.mxu0 %v2261_v58 }
  0xfb   : > { %v3320_v30 = vpop.f32.mrf.mxu1  ;;  %3743 = vmatprep.subr.mxu0 %v2260_v35 }
  0xfc   : > { %v4666_v31 = vadd.f32 %v3319_v23, %v3207_v17  ;;  %v3209_v36 = vpop.f32.mrf.mxu0  ;;  %3744 = vmatpush3.msra.mxu0 %v2260_v35 }
  0xfd   : > { %v3210_v37 = vadd.f32 %v3209_v36, %v3208_v24  ;;  %v3321_v46 = vpop.f32.mrf.mxu1 }
  0xfe   : > { %v3322_v50 = vadd.f32 %v3321_v46, %v3320_v30  ;;  %v3211_v55 = vpop.f32.mrf.mxu0  ;;  %1784 = vmatmul.mubr.bf16.gmra.mxu0 %v4494_v59 }
  0xff   : > { %v3323_v32 = vpop.f32.mrf.mxu1  ;;  %1945 = vmatmul.mubr.bf16.gmra.mxu1 %v4497_v60  ;;  %1791 = vmatprep.mubr.bf16.mxu0 %v4500_v1  ;;  %v2259_v60 = vld [vmem:[%s5027_s4] sm:$0xff] }
 0x100   : > { %v4674_v33 = vadd.f32 %v3322_v50, %v3210_v37  ;;  %v3212_v34 = vpop.f32.mrf.mxu0  ;;  %1952 = vmatprep.mubr.bf16.mxu1 %v4503_v3  ;;  %3745 = vmatprep.subr.mxu0 %v2259_v60 }
 0x101   : > { %v3213_v59 = vadd.f32 %v3212_v34, %v3211_v55  ;;  %v3324_v40 = vpop.f32.mrf.mxu1  ;;  %3746 = vmatpush3.msra.mxu0 %v2259_v60 }
 0x102   : > { %v3325_v41 = vadd.f32 %v3324_v40, %v3323_v32  ;;  %v3214_v42 = vpop.f32.mrf.mxu0 }
 0x103   : > { %v3326_v1 = vpop.f32.mrf.mxu1 }
 0x104   : > { %v4683_v43 = vadd.f32 %v3325_v41, %v3213_v59  ;;  %v3215_v3 = vpop.f32.mrf.mxu0 }
 0x105   : > { %v3216_v44 = vadd.f32 %v3215_v3, %v3214_v42  ;;  %v3327_v45 = vpop.f32.mrf.mxu1 }
 0x106   : > { %v3328_v48 = vadd.f32 %v3327_v45, %v3326_v1  ;;  %v3217_v51 = vpop.f32.mrf.mxu0  ;;  %1792 = vmatmul.mubr.bf16.gmra.mxu0 %v4510_v4 }
 0x107   : > { %v3329_v52 = vpop.f32.mrf.mxu1  ;;  %1953 = vmatmul.mubr.bf16.gmra.mxu1 %v4513_v5  ;;  %1799 = vmatprep.mubr.bf16.mxu0 %v4516_v10 }
 0x108   : > { %v4688_v53 = vadd.f32 %v3328_v48, %v3216_v44  ;;  %v3218_v54 = vpop.f32.mrf.mxu0  ;;  %1960 = vmatprep.mubr.bf16.mxu1 %v4519_v11 }
 0x109   : > { %v3219_v56 = vadd.f32 %v3218_v54, %v3217_v51  ;;  %v3330_v57 = vpop.f32.mrf.mxu1 }
 0x10a   : > { %v3331_v61 = vadd.f32 %v3330_v57, %v3329_v52  ;;  %v3220_v63 = vpop.f32.mrf.mxu0 }
 0x10b   : > { %v3332_v0 = vpop.f32.mrf.mxu1 }
 0x10c   : > { %v4691_v2 = vadd.f32 %v3331_v61, %v3219_v56  ;;  %v3221_v6 = vpop.f32.mrf.mxu0 }
 0x10d   : > { %v3222_v4 = vadd.f32 %v3221_v6, %v3220_v63  ;;  %v3333_v7 = vpop.f32.mrf.mxu1 }
 0x10e   : > { %v3334_v8 = vadd.f32 %v3333_v7, %v3332_v0  ;;  %v3223_v5 = vpop.f32.mrf.mxu0  ;;  %1800 = vmatmul.mubr.bf16.gmra.mxu0 %v4526_v12 }
 0x10f   : > { %v3335_v10 = vpop.f32.mrf.mxu1  ;;  %1961 = vmatmul.mubr.bf16.gmra.mxu1 %v4529_v13  ;;  %1807 = vmatprep.mubr.bf16.mxu0 %v4532_v18 }
 0x110   : > { %v4696_v11 = vadd.f32 %v3334_v8, %v3222_v4  ;;  %v3224_v9 = vpop.f32.mrf.mxu0  ;;  %1968 = vmatprep.mubr.bf16.mxu1 %v4535_v19 }
 0x111   : > { %v3225_v15 = vadd.f32 %v3224_v9, %v3223_v5  ;;  %v3336_v16 = vpop.f32.mrf.mxu1 }
 0x112   : > { %v3337_v17 = vadd.f32 %v3336_v16, %v3335_v10  ;;  %v3226_v22 = vpop.f32.mrf.mxu0 }
 0x113   : > { %v3338_v23 = vpop.f32.mrf.mxu1 }
 0x114   : > { %v4699_v24 = vadd.f32 %v3337_v17, %v3225_v15  ;;  %v3227_v25 = vpop.f32.mrf.mxu0 }
 0x115   : > { %v3228_v30 = vadd.f32 %v3227_v25, %v3226_v22  ;;  %v3339_v12 = vpop.f32.mrf.mxu1 }
 0x116   : > { %v3340_v36 = vadd.f32 %v3339_v12, %v3338_v23  ;;  %v3229_v37 = vpop.f32.mrf.mxu0  ;;  %1808 = vmatmul.mubr.bf16.gmra.mxu0 %v4542_v20 }
 0x117   : > { %v3341_v13 = vpop.f32.mrf.mxu1  ;;  %1969 = vmatmul.mubr.bf16.gmra.mxu1 %v4545_v21  ;;  %1815 = vmatprep.mubr.bf16.mxu0 %v4548_v26 }
 0x118   : > { %v4704_v18 = vadd.f32 %v3340_v36, %v3228_v30  ;;  %v3230_v19 = vpop.f32.mrf.mxu0  ;;  %1976 = vmatprep.mubr.bf16.mxu1 %v4551_v27 }
 0x119   : > { %v3231_v46 = vadd.f32 %v3230_v19, %v3229_v37  ;;  %v3342_v50 = vpop.f32.mrf.mxu1 }
 0x11a   : > { %v3343_v55 = vadd.f32 %v3342_v50, %v3341_v13  ;;  %v3232_v58 = vpop.f32.mrf.mxu0 }
 0x11b   : > { %v3344_v32 = vpop.f32.mrf.mxu1 }
 0x11c   : > { %v4707_v34 = vadd.f32 %v3343_v55, %v3231_v46  ;;  %v3233_v35 = vpop.f32.mrf.mxu0 }
 0x11d   : > { %v3234_v59 = vadd.f32 %v3233_v35, %v3232_v58  ;;  %v3345_v20 = vpop.f32.mrf.mxu1 }
 0x11e   : > { %v3346_v40 = vadd.f32 %v3345_v20, %v3344_v32  ;;  %v3235_v41 = vpop.f32.mrf.mxu0  ;;  %1816 = vmatmul.mubr.bf16.gmra.mxu0 %v4558_v28 }
 0x11f   : > { %v3347_v21 = vpop.f32.mrf.mxu1  ;;  %1977 = vmatmul.mubr.bf16.gmra.mxu1 %v4561_v29  ;;  %1823 = vmatprep.mubr.bf16.mxu0 %v4564_v38 }
 0x120   : > { %v4712_v26 = vadd.f32 %v3346_v40, %v3234_v59  ;;  %v3236_v27 = vpop.f32.mrf.mxu0  ;;  %1984 = vmatprep.mubr.bf16.mxu1 %v4567_v39 }
 0x121   : > { %v3237_v42 = vadd.f32 %v3236_v27, %v3235_v41  ;;  %v3348_v60 = vpop.f32.mrf.mxu1 }
 0x122   : > { %v3349_v1 = vadd.f32 %v3348_v60, %v3347_v21  ;;  %v3238_v3 = vpop.f32.mrf.mxu0 }
 0x123   : > { %v3350_v44 = vpop.f32.mrf.mxu1 }
 0x124   : > { %v4715_v45 = vadd.f32 %v3349_v1, %v3237_v42  ;;  %v3239_v48 = vpop.f32.mrf.mxu0 }
 0x125   : > { %v3240_v51 = vadd.f32 %v3239_v48, %v3238_v3  ;;  %v3351_v28 = vpop.f32.mrf.mxu1 }
 0x126   : > { %v3352_v52 = vadd.f32 %v3351_v28, %v3350_v44  ;;  %v3241_v54 = vpop.f32.mrf.mxu0  ;;  %1824 = vmatmul.mubr.bf16.gmra.mxu0 %v4574_v47 }
 0x127   : > { %v3353_v29 = vpop.f32.mrf.mxu1  ;;  %1985 = vmatmul.mubr.bf16.gmra.mxu1 %v4577_v49 }
 0x128   : > { %v4719_v38 = vadd.f32 %v3352_v52, %v3240_v51  ;;  %v3242_v39 = vpop.f32.mrf.mxu0 }
 0x129   : > { %v3243_v56 = vadd.f32 %v3242_v39, %v3241_v54  ;;  %v3354_v57 = vpop.f32.mrf.mxu1 }
 0x12a   : > { %v3355_v61 = vadd.f32 %v3354_v57, %v3353_v29  ;;  %v3244_v63 = vpop.f32.mrf.mxu0 }
 0x12b   : > { %v3356_v0 = vpop.f32.mrf.mxu1 }
 0x12c   : > { %v4721_v6 = vadd.f32 %v3355_v61, %v3243_v56  ;;  %v3245_v4 = vpop.f32.mrf.mxu0 }
 0x12d   : > { %v3246_v7 = vadd.f32 %v3245_v4, %v3244_v63  ;;  %v3357_v8 = vpop.f32.mrf.mxu1 }
 0x12e   : > { %v3358_v5 = vadd.f32 %v3357_v8, %v3356_v0  ;;  %v3247_v10 = vpop.f32.mrf.mxu0 }
 0x12f   : > { %v3359_v9 = vpop.f32.mrf.mxu1 }
 0x130   : > { %v4723_v47 = vadd.f32 %v3358_v5, %v3246_v7  ;;  %v3248_v15 = vpop.f32.mrf.mxu0 }
 0x131   : > { %v3249_v49 = vadd.f32 %v3248_v15, %v3247_v10  ;;  %v3360_v16 = vpop.f32.mrf.mxu1 }
 0x132   : > { %v3361_v17 = vadd.f32 %v3360_v16, %v3359_v9  ;;  %v3250_v22 = vpop.f32.mrf.mxu0 }
 0x133   : > { %v3362_v23 = vpop.f32.mrf.mxu1 }
 0x134   : > { %v4725_v25 = vadd.f32 %v3361_v17, %v3249_v49  ;;  %v3251_v30 = vpop.f32.mrf.mxu0 }
 0x135   : > { %v3252_v12 = vadd.f32 %v3251_v30, %v3250_v22  ;;  %v3363_v36 = vpop.f32.mrf.mxu1 }
 0x136   : > { %v3364_v37 = vadd.f32 %v3363_v36, %v3362_v23  ;;  %v3253_v13 = vpop.f32.mrf.mxu0 }
 0x137   : > { %v3365_v19 = vpop.f32.mrf.mxu1 }
 0x138   : > { %v4727_v46 = vadd.f32 %v3364_v37, %v3252_v12  ;;  %v3254_v50 = vpop.f32.mrf.mxu0 }
 0x139   : > { %v3255_v55 = vadd.f32 %v3254_v50, %v3253_v13  ;;  %v3366_v58 = vpop.f32.mrf.mxu1 }
 0x13a   : > { %v3367_v32 = vadd.f32 %v3366_v58, %v3365_v19  ;;  %v3256_v35 = vpop.f32.mrf.mxu0 }
 0x13b   : > { %v3368_v59 = vpop.f32.mrf.mxu1 }
 0x13c   : > { %v4729_v20 = vadd.f32 %v3367_v32, %v3255_v55  ;;  %v3257_v40 = vpop.f32.mrf.mxu0 }
 0x13d   : > { %v3258_v41 = vadd.f32 %v3257_v40, %v3256_v35  ;;  %v3369_v21 = vpop.f32.mrf.mxu1 }
 0x13e   : > { %v3370_v27 = vadd.f32 %v3369_v21, %v3368_v59  ;;  %v3259_v42 = vpop.f32.mrf.mxu0 }
 0x13f   : > { %v3371_v60 = vpop.f32.mrf.mxu1 }
 0x140   : > { %v4731_v1 = vadd.f32 %v3370_v27, %v3258_v41  ;;  %v3260_v3 = vpop.f32.mrf.mxu0 }
 0x141   : > { %v3261_v44 = vadd.f32 %v3260_v3, %v3259_v42  ;;  %v3372_v48 = vpop.f32.mrf.mxu1 }
 0x142   : > { %v3373_v51 = vadd.f32 %v3372_v48, %v3371_v60  ;;  %v3262_v28 = vpop.f32.mrf.mxu0 }
 0x143   : > { %v3374_v52 = vpop.f32.mrf.mxu1 }
 0x144   : > { %v4733_v54 = vadd.f32 %v3373_v51, %v3261_v44  ;;  %v3263_v29 = vpop.f32.mrf.mxu0 }
 0x145   : > { %v3264_v39 = vadd.f32 %v3263_v29, %v3262_v28  ;;  %v3375_v56 = vpop.f32.mrf.mxu1 }
 0x146   : > { %v3376_v57 = vadd.f32 %v3375_v56, %v3374_v52  ;;  %v3265_v61 = vpop.f32.mrf.mxu0 }
 0x147   : > { %v3377_v63 = vpop.f32.mrf.mxu1 }
 0x148   : > { %v4735_v0 = vadd.f32 %v3376_v57, %v3264_v39  ;;  %v3266_v4 = vpop.f32.mrf.mxu0 }
 0x149   : > { %v3267_v7 = vadd.f32 %v3266_v4, %v3265_v61  ;;  %v3378_v8 = vpop.f32.mrf.mxu1 }
 0x14a   : > { %v3379_v5 = vadd.f32 %v3378_v8, %v3377_v63  ;;  %v3268_v10 = vpop.f32.mrf.mxu0 }
 0x14b   : > { %v3380_v9 = vpop.f32.mrf.mxu1 }
 0x14c   : > { %v4737_v15 = vadd.f32 %v3379_v5, %v3267_v7  ;;  %v3269_v49 = vpop.f32.mrf.mxu0 }
 0x14d   : > { %v3270_v16 = vadd.f32 %v3269_v49, %v3268_v10  ;;  %v3381_v17 = vpop.f32.mrf.mxu1 }
 0x14e   : > { %v3382_v22 = vadd.f32 %v3381_v17, %v3380_v9  ;;  %v3271_v23 = vpop.f32.mrf.mxu0 }
 0x14f   : > { %v3383_v30 = vpop.f32.mrf.mxu1 }
 0x150   : > { %v4739_v12 = vadd.f32 %v3382_v22, %v3270_v16  ;;  %v3272_v36 = vpop.f32.mrf.mxu0 }
 0x151   : > { %v3273_v37 = vadd.f32 %v3272_v36, %v3271_v23  ;;  %v3384_v13 = vpop.f32.mrf.mxu1 }
 0x152   : > { %v3385_v19 = vadd.f32 %v3384_v13, %v3383_v30  ;;  %v3274_v50 = vpop.f32.mrf.mxu0 }
 0x153   : > { %v3386_v55 = vpop.f32.mrf.mxu1 }
 0x154   : > { %v4741_v58 = vadd.f32 %v3385_v19, %v3273_v37  ;;  %v3275_v32 = vpop.f32.mrf.mxu0 }
 0x155   : > { %v3276_v35 = vadd.f32 %v3275_v32, %v3274_v50  ;;  %v3387_v59 = vpop.f32.mrf.mxu1 }
 0x156   : > { %v3388_v40 = vadd.f32 %v3387_v59, %v3386_v55  ;;  %v3277_v41 = vpop.f32.mrf.mxu0 }
 0x157   : > { %v3389_v21 = vpop.f32.mrf.mxu1 }
 0x158   : > { %v4743_v27 = vadd.f32 %v3388_v40, %v3276_v35  ;;  %v3278_v42 = vpop.f32.mrf.mxu0 }
 0x159   : > { %v3279_v60 = vadd.f32 %v3278_v42, %v3277_v41  ;;  %v3390_v3 = vpop.f32.mrf.mxu1 }
 0x15a   : > { %v3391_v44 = vadd.f32 %v3390_v3, %v3389_v21  ;;  %v3280_v48 = vpop.f32.mrf.mxu0 }
 0x15b   : > { %v3392_v51 = vpop.f32.mrf.mxu1 }
 0x15c   : > { %v4745_v28 = vadd.f32 %v3391_v44, %v3279_v60  ;;  %v3281_v52 = vpop.f32.mrf.mxu0 }
 0x15d   : > { %v3282_v29 = vadd.f32 %v3281_v52, %v3280_v48  ;;  %v3393_v39 = vpop.f32.mrf.mxu1 }
 0x15e   : > { %v3394_v56 = vadd.f32 %v3393_v39, %v3392_v51  ;;  %v3283_v57 = vpop.f32.mrf.mxu0 }
 0x15f   : > { %v3395_v61 = vpop.f32.mrf.mxu1 }
 0x160   : > { %v4747_v63 = vadd.f32 %v3394_v56, %v3282_v29  ;;  %v3284_v4 = vpop.f32.mrf.mxu0 }
 0x161   : > { %v3285_v7 = vadd.f32 %v3284_v4, %v3283_v57  ;;  %v3396_v8 = vpop.f32.mrf.mxu1 }
 0x162   : > { %v3397_v5 = vadd.f32 %v3396_v8, %v3395_v61  ;;  %v3286_v10 = vpop.f32.mrf.mxu0  ;;  %v4761_v61 = vld [vmem:[%s5026_s3] ss:$0 sm:$0xff] }
 0x163   : > { %v3398_v9 = vpop.f32.mrf.mxu1 }
 0x164   : > { %v4749_v49 = vadd.f32 %v3397_v5, %v3285_v7  ;;  %v3287_v16 = vpop.f32.mrf.mxu0 }
 0x165   : > { %v3288_v17 = vadd.f32 %v3287_v16, %v3286_v10  ;;  %v3399_v22 = vpop.f32.mrf.mxu1 }
 0x166   : > { %v3400_v23 = vadd.f32 %v3399_v22, %v3398_v9  ;;  %v3289_v30 = vpop.f32.mrf.mxu0 }
 0x167   : > { %v3401_v36 = vpop.f32.mrf.mxu1 }
 0x168   : > { %v4751_v37 = vadd.f32 %v3400_v23, %v3288_v17  ;;  %v3290_v13 = vpop.f32.mrf.mxu0 }
 0x169   : > { %v3291_v19 = vadd.f32 %v3290_v13, %v3289_v30  ;;  %v3402_v50 = vpop.f32.mrf.mxu1 }
 0x16a   : > { %v3403_v55 = vadd.f32 %v3402_v50, %v3401_v36  ;;  %v3292_v32 = vpop.f32.mrf.mxu0 }
 0x16b   : > { %v3404_v35 = vpop.f32.mrf.mxu1 }
 0x16c   : > { %v4753_v59 = vadd.f32 %v3403_v55, %v3291_v19  ;;  %v3293_v40 = vpop.f32.mrf.mxu0  ;;  %v2542_v55 = vld [vmem:[%s5029_s6 + $0x18] sm:$0xff] }
 0x16d   : > { %v3294_v41 = vadd.f32 %v3293_v40, %v3292_v32  ;;  %v3405_v21 = vpop.f32.mrf.mxu1  ;;  %v2541_v32 = vld [vmem:[%s5029_s6 + $0x10] sm:$0xff]  ;;  %3795 = vmatprep.subr.mxu1 %v2542_v55 }
 0x16e   : > { %v3406_v42 = vadd.f32 %v3405_v21, %v3404_v35  ;;  %v3423_v60 = vpop.f32.mrf.mxu0  ;;  %3796 = vmatpush3.msra.mxu1 %v2542_v55 }
 0x16f   : > { %v3535_v3 = vpop.f32.mrf.mxu1  ;;  %3797 = vmatprep.subr.mxu1 %v2541_v32 }
 0x170   : > { %v4755_v44 = vadd.f32 %v3406_v42, %v3294_v41  ;;  %v3424_v48 = vpop.f32.mrf.mxu0  ;;  %3798 = vmatpush3.msra.mxu1 %v2541_v32 }
 0x171   : > { %v3425_v51 = vadd.f32 %v3424_v48, %v3423_v60  ;;  %v3536_v52 = vpop.f32.mrf.mxu1 }
 0x172   : > { %v3426_v29 = vpop.f32.mrf.mxu0  ;;  %v3537_v56 = vadd.f32 %v3536_v52, %v3535_v3 }
 0x173   : > { %v1706_v39 = vadd.f32 %v3425_v51, %v4649_v62  ;;  %v3538_v57 = vpop.f32.mrf.mxu1 }
 0x174   : > { %v3427_v4 = vpop.f32.mrf.mxu0 }
 0x175   : > { %v1867_v7 = vadd.f32 %v3537_v56, %v1706_v39  ;;  %v3428_v8 = vadd.f32 %v3427_v4, %v3426_v29  ;;  %v3539_v5 = vpop.f32.mrf.mxu1 }
 0x176   : > { %v3429_v10 = vpop.f32.mrf.mxu0  ;;  %v3540_v22 = vadd.f32 %v3539_v5, %v3538_v57 }
 0x177   : > { %v2099_v9 = vadd.f32 %v4761_v61, %v1867_v7  ;;  %v2163_v16 = vsub.f32 %v4761_v61, %v1867_v7  ;;  %v1709_v17 = vadd.f32 %v3428_v8, %v4657_v14  ;;  %v3541_v62 = vpop.f32.mrf.mxu1 }
 0x178   : > { %v3430_v23 = vpop.f32.mrf.mxu0 }
 0x179   : > { %v2131_v30 = vmax.f32 %v2099_v9, 0.0  ;;  %v2195_v36 = vmax.f32 %v2163_v16, 0.0  ;;  %v1870_v13 = vadd.f32 %v3540_v22, %v1709_v17  ;;  %v3431_v19 = vadd.f32 %v3430_v23, %v3429_v10  ;;  %v3542_v50 = vpop.f32.mrf.mxu1 }
 0x17a   : > { %v3543_v35 = vadd.f32 %v3542_v50, %v3541_v62  ;;  %v3432_v40 = vpop.f32.mrf.mxu0 }
 0x17b   : > { %v2100_v14 = vadd.f32 %v4761_v61, %v1870_v13  ;;  %v2164_v41 = vsub.f32 %v4761_v61, %v1870_v13  ;;  %v1714_v21 = vadd.f32 %v3431_v19, %v4666_v31  ;;  %v3544_v42 = vpop.f32.mrf.mxu1  ;;  %v2227_v60 = vadd.f32 %v2195_v36, %v2131_v30 }
 0x17c   : > { %v3433_v3 = vpop.f32.mrf.mxu0 }
 0x17d   : > { %v2132_v48 = vmax.f32 %v2100_v14, 0.0  ;;  %v2196_v51 = vmax.f32 %v2164_v41, 0.0  ;;  %v1875_v52 = vadd.f32 %v3543_v35, %v1714_v21  ;;  %v3434_v29 = vadd.f32 %v3433_v3, %v3432_v40  ;;  %v3545_v39 = vpop.f32.mrf.mxu1  ;;  %3747 = vmatprep.mubr.f32.mxu0 %v2227_v60 }
 0x17e   : > { %v3546_v56 = vadd.f32 %v3545_v39, %v3544_v42  ;;  %v3435_v57 = vpop.f32.mrf.mxu0 }
 0x17f   : > { %v2228_v4 = vadd.f32 %v2196_v51, %v2132_v48  ;;  %v2101_v7 = vadd.f32 %v4761_v61, %v1875_v52  ;;  %v2165_v8 = vsub.f32 %v4761_v61, %v1875_v52  ;;  %v1717_v31 = vadd.f32 %v3434_v29, %v4674_v33  ;;  %v3547_v5 = vpop.f32.mrf.mxu1 }
 0x180   : > { %v3436_v10 = vpop.f32.mrf.mxu0 }
 0x181   : > { %v2133_v9 = vmax.f32 %v2101_v7, 0.0  ;;  %v2197_v16 = vmax.f32 %v2165_v8, 0.0  ;;  %v1878_v17 = vadd.f32 %v3546_v56, %v1717_v31  ;;  %v3437_v22 = vadd.f32 %v3436_v10, %v3435_v57  ;;  %v3548_v62 = vpop.f32.mrf.mxu1  ;;  %3748 = vmatmul.mubr.f32.vlgmr.msra.gmra.mxu0 %v2228_v4 }
 0x182   : > { %v3549_v23 = vadd.f32 %v3548_v62, %v3547_v5  ;;  %v3438_v30 = vpop.f32.mrf.mxu0 }
 0x183   : > { %v2102_v36 = vadd.f32 %v4761_v61, %v1878_v17  ;;  %v2166_v13 = vsub.f32 %v4761_v61, %v1878_v17  ;;  %v1722_v19 = vadd.f32 %v3437_v22, %v4683_v43  ;;  %v3550_v50 = vpop.f32.mrf.mxu1  ;;  %v2229_v55 = vadd.f32 %v2197_v16, %v2133_v9 }
 0x184   : > { %v3439_v32 = vpop.f32.mrf.mxu0 }
 0x185   : > { %v2134_v33 = vmax.f32 %v2102_v36, 0.0  ;;  %v2198_v35 = vmax.f32 %v2166_v13, 0.0  ;;  %v1883_v40 = vadd.f32 %v3549_v23, %v1722_v19  ;;  %v3440_v14 = vadd.f32 %v3439_v32, %v3438_v30  ;;  %v3551_v41 = vpop.f32.mrf.mxu1  ;;  %3750 = vmatprep.mubr.f32.mxu0 %v2229_v55 }
 0x186   : > { %v3552_v21 = vadd.f32 %v3551_v41, %v3550_v50  ;;  %v3441_v42 = vpop.f32.mrf.mxu0 }
 0x187   : > { %v2230_v60 = vadd.f32 %v2198_v35, %v2134_v33  ;;  %v2103_v3 = vadd.f32 %v4761_v61, %v1883_v40  ;;  %v2167_v48 = vsub.f32 %v4761_v61, %v1883_v40  ;;  %v1725_v51 = vadd.f32 %v3440_v14, %v4688_v53  ;;  %v3553_v52 = vpop.f32.mrf.mxu1 }
 0x188   : > { %v3442_v43 = vpop.f32.mrf.mxu0 }
 0x189   : > { %v2135_v29 = vmax.f32 %v2103_v3, 0.0  ;;  %v2199_v39 = vmax.f32 %v2167_v48, 0.0  ;;  %v1886_v56 = vadd.f32 %v3552_v21, %v1725_v51  ;;  %v3443_v57 = vadd.f32 %v3442_v43, %v3441_v42  ;;  %v3554_v4 = vpop.f32.mrf.mxu1  ;;  %3751 = vmatmul.mubr.f32.gmra.mxu0 %v2230_v60 }
 0x18a   : > { %v3555_v7 = vadd.f32 %v3554_v4, %v3553_v52  ;;  %v3444_v8 = vpop.f32.mrf.mxu0 }
 0x18b   : > { %v2104_v31 = vadd.f32 %v4761_v61, %v1886_v56  ;;  %v2168_v5 = vsub.f32 %v4761_v61, %v1886_v56  ;;  %v1730_v10 = vadd.f32 %v3443_v57, %v4691_v2  ;;  %v3556_v9 = vpop.f32.mrf.mxu1  ;;  %v2231_v16 = vadd.f32 %v2199_v39, %v2135_v29 }
 0x18c   : > { %v3445_v17 = vpop.f32.mrf.mxu0 }
 0x18d   : > { %v2136_v53 = vmax.f32 %v2104_v31, 0.0  ;;  %v2200_v22 = vmax.f32 %v2168_v5, 0.0  ;;  %v1891_v62 = vadd.f32 %v3555_v7, %v1730_v10  ;;  %v3446_v23 = vadd.f32 %v3445_v17, %v3444_v8  ;;  %v3557_v30 = vpop.f32.mrf.mxu1  ;;  %3753 = vmatprep.mubr.f32.mxu0 %v2231_v16 }
 0x18e   : > { %v3558_v36 = vadd.f32 %v3557_v30, %v3556_v9  ;;  %v3447_v13 = vpop.f32.mrf.mxu0 }
 0x18f   : > { %v2232_v19 = vadd.f32 %v2200_v22, %v2136_v53  ;;  %v2105_v50 = vadd.f32 %v4761_v61, %v1891_v62  ;;  %v2169_v55 = vsub.f32 %v4761_v61, %v1891_v62  ;;  %v1733_v32 = vadd.f32 %v3446_v23, %v4696_v11  ;;  %v3559_v33 = vpop.f32.mrf.mxu1 }
 0x190   : > { %v3448_v2 = vpop.f32.mrf.mxu0 }
 0x191   : > { %v2137_v35 = vmax.f32 %v2105_v50, 0.0  ;;  %v2201_v40 = vmax.f32 %v2169_v55, 0.0  ;;  %v1894_v14 = vadd.f32 %v3558_v36, %v1733_v32  ;;  %v3449_v41 = vadd.f32 %v3448_v2, %v3447_v13  ;;  %v3560_v21 = vpop.f32.mrf.mxu1  ;;  %3754 = vmatmul.mubr.f32.gmra.mxu0 %v2232_v19 }
 0x192   : > { %v3561_v42 = vadd.f32 %v3560_v21, %v3559_v33  ;;  %v3450_v60 = vpop.f32.mrf.mxu0 }
 0x193   : > { %v2106_v3 = vadd.f32 %v4761_v61, %v1894_v14  ;;  %v2170_v48 = vsub.f32 %v4761_v61, %v1894_v14  ;;  %v1738_v51 = vadd.f32 %v3449_v41, %v4699_v24  ;;  %v3562_v52 = vpop.f32.mrf.mxu1  ;;  %v2233_v43 = vadd.f32 %v2201_v40, %v2137_v35 }
 0x194   : > { %v3451_v29 = vpop.f32.mrf.mxu0 }
 0x195   : > { %v2138_v11 = vmax.f32 %v2106_v3, 0.0  ;;  %v2202_v39 = vmax.f32 %v2170_v48, 0.0  ;;  %v1899_v56 = vadd.f32 %v3561_v42, %v1738_v51  ;;  %v3452_v57 = vadd.f32 %v3451_v29, %v3450_v60  ;;  %v3563_v4 = vpop.f32.mrf.mxu1  ;;  %3756 = vmatprep.mubr.f32.mxu0 %v2233_v43 }
 0x196   : > { %v3564_v7 = vadd.f32 %v3563_v4, %v3562_v52  ;;  %v3453_v8 = vpop.f32.mrf.mxu0 }
 0x197   : > { %v2234_v31 = vadd.f32 %v2202_v39, %v2138_v11  ;;  %v2107_v5 = vadd.f32 %v4761_v61, %v1899_v56  ;;  %v2171_v10 = vsub.f32 %v4761_v61, %v1899_v56  ;;  %v1741_v9 = vadd.f32 %v3452_v57, %v4704_v18  ;;  %v3565_v16 = vpop.f32.mrf.mxu1 }
 0x198   : > { %v3454_v24 = vpop.f32.mrf.mxu0 }
 0x199   : > { %v2139_v17 = vmax.f32 %v2107_v5, 0.0  ;;  %v2203_v53 = vmax.f32 %v2171_v10, 0.0  ;;  %v1902_v22 = vadd.f32 %v3564_v7, %v1741_v9  ;;  %v3455_v62 = vadd.f32 %v3454_v24, %v3453_v8  ;;  %v3566_v23 = vpop.f32.mrf.mxu1  ;;  %3757 = vmatmul.mubr.f32.gmra.mxu0 %v2234_v31 }
 0x19a   : > { %v3567_v30 = vadd.f32 %v3566_v23, %v3565_v16  ;;  %v3456_v36 = vpop.f32.mrf.mxu0 }
 0x19b   : > { %v2108_v13 = vadd.f32 %v4761_v61, %v1902_v22  ;;  %v2172_v19 = vsub.f32 %v4761_v61, %v1902_v22  ;;  %v1746_v50 = vadd.f32 %v3455_v62, %v4707_v34  ;;  %v3568_v55 = vpop.f32.mrf.mxu1  ;;  %v2235_v32 = vadd.f32 %v2203_v53, %v2139_v17 }
 0x19c   : > { %v3457_v33 = vpop.f32.mrf.mxu0 }
 0x19d   : > { %v2140_v18 = vmax.f32 %v2108_v13, 0.0  ;;  %v2204_v2 = vmax.f32 %v2172_v19, 0.0  ;;  %v1907_v35 = vadd.f32 %v3567_v30, %v1746_v50  ;;  %v3458_v40 = vadd.f32 %v3457_v33, %v3456_v36  ;;  %v3569_v14 = vpop.f32.mrf.mxu1  ;;  %3759 = vmatprep.mubr.f32.mxu0 %v2235_v32 }
 0x19e   : > { %v3570_v41 = vadd.f32 %v3569_v14, %v3568_v55  ;;  %v3459_v21 = vpop.f32.mrf.mxu0 }
 0x19f   : > { %v2236_v42 = vadd.f32 %v2204_v2, %v2140_v18  ;;  %v2109_v60 = vadd.f32 %v4761_v61, %v1907_v35  ;;  %v2173_v3 = vsub.f32 %v4761_v61, %v1907_v35  ;;  %v1749_v48 = vadd.f32 %v3458_v40, %v4712_v26  ;;  %v3571_v51 = vpop.f32.mrf.mxu1 }
 0x1a0   : > { %v3460_v34 = vpop.f32.mrf.mxu0 }
 0x1a1   : > { %v2141_v52 = vmax.f32 %v2109_v60, 0.0  ;;  %v2205_v43 = vmax.f32 %v2173_v3, 0.0  ;;  %v1910_v29 = vadd.f32 %v3570_v41, %v1749_v48  ;;  %v3461_v11 = vadd.f32 %v3460_v34, %v3459_v21  ;;  %v3572_v39 = vpop.f32.mrf.mxu1  ;;  %3760 = vmatmul.mubr.f32.gmra.mxu0 %v2236_v42 }
 0x1a2   : > { %v3573_v56 = vadd.f32 %v3572_v39, %v3571_v51  ;;  %v3462_v57 = vpop.f32.mrf.mxu0 }
 0x1a3   : > { %v2110_v4 = vadd.f32 %v4761_v61, %v1910_v29  ;;  %v2174_v7 = vsub.f32 %v4761_v61, %v1910_v29  ;;  %v1754_v8 = vadd.f32 %v3461_v11, %v4715_v45  ;;  %v3574_v31 = vpop.f32.mrf.mxu1  ;;  %v2237_v5 = vadd.f32 %v2205_v43, %v2141_v52 }
 0x1a4   : > { %v3463_v10 = vpop.f32.mrf.mxu0 }
 0x1a5   : > { %v2142_v26 = vmax.f32 %v2110_v4, 0.0  ;;  %v2206_v9 = vmax.f32 %v2174_v7, 0.0  ;;  %v1915_v16 = vadd.f32 %v3573_v56, %v1754_v8  ;;  %v3464_v24 = vadd.f32 %v3463_v10, %v3462_v57  ;;  %v3575_v17 = vpop.f32.mrf.mxu1  ;;  %3762 = vmatprep.mubr.f32.mxu0 %v2237_v5 }
 0x1a6   : > { %v3576_v53 = vadd.f32 %v3575_v17, %v3574_v31  ;;  %v3465_v22 = vpop.f32.mrf.mxu0 }
 0x1a7   : > { %v2238_v62 = vadd.f32 %v2206_v9, %v2142_v26  ;;  %v2111_v23 = vadd.f32 %v4761_v61, %v1915_v16  ;;  %v2175_v30 = vsub.f32 %v4761_v61, %v1915_v16  ;;  %v1757_v36 = vadd.f32 %v3464_v24, %v4719_v38  ;;  %v3577_v13 = vpop.f32.mrf.mxu1 }
 0x1a8   : > { %v3466_v45 = vpop.f32.mrf.mxu0 }
 0x1a9   : > { %v2143_v19 = vmax.f32 %v2111_v23, 0.0  ;;  %v2207_v50 = vmax.f32 %v2175_v30, 0.0  ;;  %v1918_v55 = vadd.f32 %v3576_v53, %v1757_v36  ;;  %v3467_v32 = vadd.f32 %v3466_v45, %v3465_v22  ;;  %v3578_v33 = vpop.f32.mrf.mxu1  ;;  %3763 = vmatmul.mubr.f32.gmra.mxu0 %v2238_v62 }
 0x1aa   : > { %v3579_v18 = vadd.f32 %v3578_v33, %v3577_v13  ;;  %v3468_v2 = vpop.f32.mrf.mxu0 }
 0x1ab   : > { %v2112_v35 = vadd.f32 %v4761_v61, %v1918_v55  ;;  %v2176_v40 = vsub.f32 %v4761_v61, %v1918_v55  ;;  %v1762_v14 = vadd.f32 %v3467_v32, %v4721_v6  ;;  %v3580_v41 = vpop.f32.mrf.mxu1  ;;  %v2239_v21 = vadd.f32 %v2207_v50, %v2143_v19 }
 0x1ac   : > { %v3469_v42 = vpop.f32.mrf.mxu0 }
 0x1ad   : > { %v2144_v38 = vmax.f32 %v2112_v35, 0.0  ;;  %v2208_v60 = vmax.f32 %v2176_v40, 0.0  ;;  %v1923_v3 = vadd.f32 %v3579_v18, %v1762_v14  ;;  %v3470_v48 = vadd.f32 %v3469_v42, %v3468_v2  ;;  %v3581_v51 = vpop.f32.mrf.mxu1  ;;  %3765 = vmatprep.mubr.f32.mxu0 %v2239_v21 }
 0x1ae   : > { %v3582_v34 = vadd.f32 %v3581_v51, %v3580_v41  ;;  %v3471_v52 = vpop.f32.mrf.mxu0 }
 0x1af   : > { %v2240_v43 = vadd.f32 %v2208_v60, %v2144_v38  ;;  %v2113_v29 = vadd.f32 %v4761_v61, %v1923_v3  ;;  %v2177_v11 = vsub.f32 %v4761_v61, %v1923_v3  ;;  %v1765_v39 = vadd.f32 %v3470_v48, %v4723_v47  ;;  %v3583_v56 = vpop.f32.mrf.mxu1 }
 0x1b0   : > { %v3472_v6 = vpop.f32.mrf.mxu0 }
 0x1b1   : > { %v2145_v57 = vmax.f32 %v2113_v29, 0.0  ;;  %v2209_v4 = vmax.f32 %v2177_v11, 0.0  ;;  %v1926_v7 = vadd.f32 %v3582_v34, %v1765_v39  ;;  %v3473_v8 = vadd.f32 %v3472_v6, %v3471_v52  ;;  %v3584_v31 = vpop.f32.mrf.mxu1  ;;  %3766 = vmatmul.mubr.f32.gmra.mxu0 %v2240_v43 }
 0x1b2   : > { %v3585_v5 = vadd.f32 %v3584_v31, %v3583_v56  ;;  %v3474_v10 = vpop.f32.mrf.mxu0 }
 0x1b3   : > { %v2114_v26 = vadd.f32 %v4761_v61, %v1926_v7  ;;  %v2178_v9 = vsub.f32 %v4761_v61, %v1926_v7  ;;  %v1770_v16 = vadd.f32 %v3473_v8, %v4725_v25  ;;  %v3586_v24 = vpop.f32.mrf.mxu1  ;;  %v2241_v17 = vadd.f32 %v2209_v4, %v2145_v57 }
 0x1b4   : > { %v3475_v53 = vpop.f32.mrf.mxu0 }
 0x1b5   : > { %v2146_v47 = vmax.f32 %v2114_v26, 0.0  ;;  %v2210_v22 = vmax.f32 %v2178_v9, 0.0  ;;  %v1931_v62 = vadd.f32 %v3585_v5, %v1770_v16  ;;  %v3476_v23 = vadd.f32 %v3475_v53, %v3474_v10  ;;  %v3587_v30 = vpop.f32.mrf.mxu1  ;;  %3768 = vmatprep.mubr.f32.mxu0 %v2241_v17 }
 0x1b6   : > { %v3588_v36 = vadd.f32 %v3587_v30, %v3586_v24  ;;  %v3477_v13 = vpop.f32.mrf.mxu0 }
 0x1b7   : > { %v2242_v45 = vadd.f32 %v2210_v22, %v2146_v47  ;;  %v2115_v19 = vadd.f32 %v4761_v61, %v1931_v62  ;;  %v2179_v50 = vsub.f32 %v4761_v61, %v1931_v62  ;;  %v1773_v55 = vadd.f32 %v3476_v23, %v4727_v46  ;;  %v3589_v32 = vpop.f32.mrf.mxu1 }
 0x1b8   : > { %v3478_v25 = vpop.f32.mrf.mxu0 }
 0x1b9   : > { %v2147_v33 = vmax.f32 %v2115_v19, 0.0  ;;  %v2211_v18 = vmax.f32 %v2179_v50, 0.0  ;;  %v1934_v2 = vadd.f32 %v3588_v36, %v1773_v55  ;;  %v3479_v35 = vadd.f32 %v3478_v25, %v3477_v13  ;;  %v3590_v40 = vpop.f32.mrf.mxu1  ;;  %3769 = vmatmul.mubr.f32.gmra.mxu0 %v2242_v45  ;;  %v2540_v13 = vld [vmem:[%s5029_s6 + $0x8] sm:$0xff] }
 0x1ba   : > { %v3591_v14 = vadd.f32 %v3590_v40, %v3589_v32  ;;  %v3480_v41 = vpop.f32.mrf.mxu0  ;;  %3799 = vmatprep.subr.mxu1 %v2540_v13 }
 0x1bb   : > { %v2116_v21 = vadd.f32 %v4761_v61, %v1934_v2  ;;  %v2180_v42 = vsub.f32 %v4761_v61, %v1934_v2  ;;  %v1778_v38 = vadd.f32 %v3479_v35, %v4729_v20  ;;  %v3592_v60 = vpop.f32.mrf.mxu1  ;;  %v2243_v3 = vadd.f32 %v2211_v18, %v2147_v33  ;;  %3800 = vmatpush3.msra.mxu1 %v2540_v13 }
 0x1bc   : > { %v3481_v48 = vpop.f32.mrf.mxu0 }
 0x1bd   : > { %v2148_v46 = vmax.f32 %v2116_v21, 0.0  ;;  %v2212_v51 = vmax.f32 %v2180_v42, 0.0  ;;  %v1939_v34 = vadd.f32 %v3591_v14, %v1778_v38  ;;  %v3482_v52 = vadd.f32 %v3481_v48, %v3480_v41  ;;  %v3593_v43 = vpop.f32.mrf.mxu1  ;;  %3771 = vmatprep.mubr.f32.mxu0 %v2243_v3 }
 0x1be   : > { %v3594_v29 = vadd.f32 %v3593_v43, %v3592_v60  ;;  %v3483_v11 = vpop.f32.mrf.mxu0 }
 0x1bf   : > { %v2244_v39 = vadd.f32 %v2212_v51, %v2148_v46  ;;  %v2117_v56 = vadd.f32 %v4761_v61, %v1939_v34  ;;  %v2181_v6 = vsub.f32 %v4761_v61, %v1939_v34  ;;  %v1781_v57 = vadd.f32 %v3482_v52, %v4731_v1  ;;  %v3595_v4 = vpop.f32.mrf.mxu1 }
 0x1c0   : > { %v3484_v20 = vpop.f32.mrf.mxu0 }
 0x1c1   : > { %v2149_v7 = vmax.f32 %v2117_v56, 0.0  ;;  %v2213_v8 = vmax.f32 %v2181_v6, 0.0  ;;  %v1942_v31 = vadd.f32 %v3594_v29, %v1781_v57  ;;  %v3485_v5 = vadd.f32 %v3484_v20, %v3483_v11  ;;  %v3596_v10 = vpop.f32.mrf.mxu1  ;;  %3772 = vmatmul.mubr.f32.gmra.mxu0 %v2244_v39 }
 0x1c2   : > { %v3597_v26 = vadd.f32 %v3596_v10, %v3595_v4  ;;  %v3486_v9 = vpop.f32.mrf.mxu0 }
 0x1c3   : > { %v2118_v16 = vadd.f32 %v4761_v61, %v1942_v31  ;;  %v2182_v24 = vsub.f32 %v4761_v61, %v1942_v31  ;;  %v1786_v17 = vadd.f32 %v3485_v5, %v4733_v54  ;;  %v3598_v53 = vpop.f32.mrf.mxu1  ;;  %v2245_v47 = vadd.f32 %v2213_v8, %v2149_v7  ;;  %v2539_v54 = vld [vmem:[%s5029_s6] sm:$0xff] }
 0x1c4   : > { %v3487_v22 = vpop.f32.mrf.mxu0  ;;  %3801 = vmatprep.subr.mxu1 %v2539_v54 }
 0x1c5   : > { %v2150_v1 = vmax.f32 %v2118_v16, 0.0  ;;  %v2214_v62 = vmax.f32 %v2182_v24, 0.0  ;;  %v1947_v23 = vadd.f32 %v3597_v26, %v1786_v17  ;;  %v3488_v30 = vadd.f32 %v3487_v22, %v3486_v9  ;;  %v3599_v36 = vpop.f32.mrf.mxu1  ;;  %3774 = vmatprep.mubr.f32.mxu0 %v2245_v47  ;;  %3802 = vmatpush3.msra.mxu1 %v2539_v54 }
 0x1c6   : > { %v3600_v45 = vadd.f32 %v3599_v36, %v3598_v53  ;;  %v3489_v19 = vpop.f32.mrf.mxu0 }
 0x1c7   : > { %v2246_v50 = vadd.f32 %v2214_v62, %v2150_v1  ;;  %v2119_v55 = vadd.f32 %v4761_v61, %v1947_v23  ;;  %v2183_v32 = vsub.f32 %v4761_v61, %v1947_v23  ;;  %v1789_v25 = vadd.f32 %v3488_v30, %v4735_v0  ;;  %v3601_v33 = vpop.f32.mrf.mxu1 }
 0x1c8   : > { %v3490_v18 = vpop.f32.mrf.mxu0 }
 0x1c9   : > { %v2151_v2 = vmax.f32 %v2119_v55, 0.0  ;;  %v2215_v35 = vmax.f32 %v2183_v32, 0.0  ;;  %v1950_v40 = vadd.f32 %v3600_v45, %v1789_v25  ;;  %v3491_v14 = vadd.f32 %v3490_v18, %v3489_v19  ;;  %v3602_v41 = vpop.f32.mrf.mxu1  ;;  %3775 = vmatmul.mubr.f32.gmra.mxu0 %v2246_v50 }
 0x1ca   : > { %v3603_v21 = vadd.f32 %v3602_v41, %v3601_v33  ;;  %v3492_v42 = vpop.f32.mrf.mxu0 }
 0x1cb   : > { %v2120_v38 = vadd.f32 %v4761_v61, %v1950_v40  ;;  %v2184_v60 = vsub.f32 %v4761_v61, %v1950_v40  ;;  %v1794_v3 = vadd.f32 %v3491_v14, %v4737_v15  ;;  %v3604_v0 = vpop.f32.mrf.mxu1  ;;  %v2247_v48 = vadd.f32 %v2215_v35, %v2151_v2 }
 0x1cc   : > { %v3493_v46 = vpop.f32.mrf.mxu0 }
 0x1cd   : > { %v2152_v51 = vmax.f32 %v2120_v38, 0.0  ;;  %v2216_v34 = vmax.f32 %v2184_v60, 0.0  ;;  %v1955_v52 = vadd.f32 %v3603_v21, %v1794_v3  ;;  %v3494_v43 = vadd.f32 %v3493_v46, %v3492_v42  ;;  %v3605_v29 = vpop.f32.mrf.mxu1  ;;  %3777 = vmatprep.mubr.f32.mxu0 %v2247_v48 }
 0x1ce   : > { %v3606_v11 = vadd.f32 %v3605_v29, %v3604_v0  ;;  %v3495_v39 = vpop.f32.mrf.mxu0 }
 0x1cf   : > { %v2248_v56 = vadd.f32 %v2216_v34, %v2152_v51  ;;  %v2121_v6 = vadd.f32 %v4761_v61, %v1955_v52  ;;  %v2185_v57 = vsub.f32 %v4761_v61, %v1955_v52  ;;  %v1797_v4 = vadd.f32 %v3494_v43, %v4739_v12  ;;  %v3607_v20 = vpop.f32.mrf.mxu1 }
 0x1d0   : > { %v3496_v15 = vpop.f32.mrf.mxu0 }
 0x1d1   : > { %v2153_v7 = vmax.f32 %v2121_v6, 0.0  ;;  %v2217_v8 = vmax.f32 %v2185_v57, 0.0  ;;  %v1958_v31 = vadd.f32 %v3606_v11, %v1797_v4  ;;  %v3497_v5 = vadd.f32 %v3496_v15, %v3495_v39  ;;  %v3608_v10 = vpop.f32.mrf.mxu1  ;;  %3778 = vmatmul.mubr.f32.gmra.mxu0 %v2248_v56 }
 0x1d2   : > { %v3609_v26 = vadd.f32 %v3608_v10, %v3607_v20  ;;  %v3498_v9 = vpop.f32.mrf.mxu0 }
 0x1d3   : > { %v2122_v16 = vadd.f32 %v4761_v61, %v1958_v31  ;;  %v2186_v24 = vsub.f32 %v4761_v61, %v1958_v31  ;;  %v1802_v17 = vadd.f32 %v3497_v5, %v4741_v58  ;;  %v3610_v53 = vpop.f32.mrf.mxu1  ;;  %v2249_v47 = vadd.f32 %v2217_v8, %v2153_v7 }
 0x1d4   : > { %v3499_v22 = vpop.f32.mrf.mxu0 }
 0x1d5   : > { %v2154_v12 = vmax.f32 %v2122_v16, 0.0  ;;  %v2218_v1 = vmax.f32 %v2186_v24, 0.0  ;;  %v1963_v62 = vadd.f32 %v3609_v26, %v1802_v17  ;;  %v3500_v23 = vadd.f32 %v3499_v22, %v3498_v9  ;;  %v3611_v30 = vpop.f32.mrf.mxu1  ;;  %3780 = vmatprep.mubr.f32.mxu0 %v2249_v47 }
 0x1d6   : > { %v3612_v36 = vadd.f32 %v3611_v30, %v3610_v53  ;;  %v3501_v13 = vpop.f32.mrf.mxu0 }
 0x1d7   : > { %v2250_v45 = vadd.f32 %v2218_v1, %v2154_v12  ;;  %v2123_v19 = vadd.f32 %v4761_v61, %v1963_v62  ;;  %v2187_v54 = vsub.f32 %v4761_v61, %v1963_v62  ;;  %v1805_v50 = vadd.f32 %v3500_v23, %v4743_v27  ;;  %v3613_v55 = vpop.f32.mrf.mxu1 }
 0x1d8   : > { %v3502_v58 = vpop.f32.mrf.mxu0 }
 0x1d9   : > { %v2155_v32 = vmax.f32 %v2123_v19, 0.0  ;;  %v2219_v25 = vmax.f32 %v2187_v54, 0.0  ;;  %v1966_v33 = vadd.f32 %v3612_v36, %v1805_v50  ;;  %v3503_v18 = vadd.f32 %v3502_v58, %v3501_v13  ;;  %v3614_v2 = vpop.f32.mrf.mxu1  ;;  %3781 = vmatmul.mubr.f32.gmra.mxu0 %v2250_v45 }
 0x1da   : > { %v3615_v35 = vadd.f32 %v3614_v2, %v3613_v55  ;;  %v3504_v40 = vpop.f32.mrf.mxu0 }
 0x1db   : > { %v2124_v14 = vadd.f32 %v4761_v61, %v1966_v33  ;;  %v2188_v41 = vsub.f32 %v4761_v61, %v1966_v33  ;;  %v1810_v21 = vadd.f32 %v3503_v18, %v4745_v28  ;;  %v3616_v42 = vpop.f32.mrf.mxu1  ;;  %v2251_v38 = vadd.f32 %v2219_v25, %v2155_v32 }
 0x1dc   : > { %v3505_v60 = vpop.f32.mrf.mxu0 }
 0x1dd   : > { %v2156_v27 = vmax.f32 %v2124_v14, 0.0  ;;  %v2220_v3 = vmax.f32 %v2188_v41, 0.0  ;;  %v1971_v0 = vadd.f32 %v3615_v35, %v1810_v21  ;;  %v3506_v48 = vadd.f32 %v3505_v60, %v3504_v40  ;;  %v3617_v46 = vpop.f32.mrf.mxu1  ;;  %3783 = vmatprep.mubr.f32.mxu0 %v2251_v38 }
 0x1de   : > { %v3618_v51 = vadd.f32 %v3617_v46, %v3616_v42  ;;  %v3507_v34 = vpop.f32.mrf.mxu0 }
 0x1df   : > { %v2252_v52 = vadd.f32 %v2220_v3, %v2156_v27  ;;  %v2125_v43 = vadd.f32 %v4761_v61, %v1971_v0  ;;  %v2189_v29 = vsub.f32 %v4761_v61, %v1971_v0  ;;  %v1813_v11 = vadd.f32 %v3506_v48, %v4747_v63  ;;  %v3619_v39 = vpop.f32.mrf.mxu1 }
 0x1e0   : > { %v3508_v28 = vpop.f32.mrf.mxu0 }
 0x1e1   : > { %v2157_v56 = vmax.f32 %v2125_v43, 0.0  ;;  %v2221_v6 = vmax.f32 %v2189_v29, 0.0  ;;  %v1974_v57 = vadd.f32 %v3618_v51, %v1813_v11  ;;  %v3509_v4 = vadd.f32 %v3508_v28, %v3507_v34  ;;  %v3620_v20 = vpop.f32.mrf.mxu1  ;;  %3784 = vmatmul.mubr.f32.gmra.mxu0 %v2252_v52  ;;  %v4873_v29 = vld [vmem:[%s5028_s5] ss:$0 sm:$0xff] }
 0x1e2   : > { %v3621_v15 = vadd.f32 %v3620_v20, %v3619_v39  ;;  %v3510_v7 = vpop.f32.mrf.mxu0 }
 0x1e3   : > { %v2126_v8 = vadd.f32 %v4761_v61, %v1974_v57  ;;  %v2190_v31 = vsub.f32 %v4761_v61, %v1974_v57  ;;  %v1818_v5 = vadd.f32 %v3509_v4, %v4749_v49  ;;  %v3622_v10 = vpop.f32.mrf.mxu1  ;;  %v2253_v26 = vadd.f32 %v2221_v6, %v2157_v56 }
 0x1e4   : > { %v3511_v9 = vpop.f32.mrf.mxu0 }
 0x1e5   : > { %v2158_v63 = vmax.f32 %v2126_v8, 0.0  ;;  %v2222_v16 = vmax.f32 %v2190_v31, 0.0  ;;  %v1979_v24 = vadd.f32 %v3621_v15, %v1818_v5  ;;  %v3512_v17 = vadd.f32 %v3511_v9, %v3510_v7  ;;  %v3623_v53 = vpop.f32.mrf.mxu1  ;;  %3786 = vmatprep.mubr.f32.mxu0 %v2253_v26 }
 0x1e6   : > { %v3624_v47 = vadd.f32 %v3623_v53, %v3622_v10  ;;  %v3513_v22 = vpop.f32.mrf.mxu0 }
 0x1e7   : > { %v2254_v12 = vadd.f32 %v2222_v16, %v2158_v63  ;;  %v2127_v1 = vadd.f32 %v4761_v61, %v1979_v24  ;;  %v2191_v62 = vsub.f32 %v4761_v61, %v1979_v24  ;;  %v1821_v23 = vadd.f32 %v3512_v17, %v4751_v37  ;;  %v3625_v30 = vpop.f32.mrf.mxu1 }
 0x1e8   : > { %v3514_v49 = vpop.f32.mrf.mxu0 }
 0x1e9   : > { %v2159_v36 = vmax.f32 %v2127_v1, 0.0  ;;  %v2223_v13 = vmax.f32 %v2191_v62, 0.0  ;;  %v1982_v45 = vadd.f32 %v3624_v47, %v1821_v23  ;;  %v3515_v19 = vadd.f32 %v3514_v49, %v3513_v22  ;;  %v3626_v54 = vpop.f32.mrf.mxu1  ;;  %3787 = vmatmul.mubr.f32.gmra.mxu0 %v2254_v12 }
 0x1ea   : > { %v3627_v50 = vadd.f32 %v3626_v54, %v3625_v30  ;;  %v3516_v55 = vpop.f32.mrf.mxu0 }
 0x1eb   : > { %v2128_v58 = vadd.f32 %v4761_v61, %v1982_v45  ;;  %v2192_v32 = vsub.f32 %v4761_v61, %v1982_v45  ;;  %v1826_v25 = vadd.f32 %v3515_v19, %v4753_v59  ;;  %v3628_v33 = vpop.f32.mrf.mxu1  ;;  %v2255_v18 = vadd.f32 %v2223_v13, %v2159_v36 }
 0x1ec   : > { %v3517_v2 = vpop.f32.mrf.mxu0 }
 0x1ed   : > { %v2160_v37 = vmax.f32 %v2128_v58, 0.0  ;;  %v2224_v35 = vmax.f32 %v2192_v32, 0.0  ;;  %v1987_v40 = vadd.f32 %v3627_v50, %v1826_v25  ;;  %v3518_v14 = vadd.f32 %v3517_v2, %v3516_v55  ;;  %v3629_v41 = vpop.f32.mrf.mxu1  ;;  %3789 = vmatprep.mubr.f32.mxu0 %v2255_v18 }
 0x1ee   : > { %v3630_v21 = vadd.f32 %v3629_v41, %v3628_v33 }
 0x1ef   : > { %v2256_v42 = vadd.f32 %v2224_v35, %v2160_v37  ;;  %v2129_v38 = vadd.f32 %v4761_v61, %v1987_v40  ;;  %v2193_v60 = vsub.f32 %v4761_v61, %v1987_v40  ;;  %v1829_v27 = vadd.f32 %v3518_v14, %v4755_v44 }
 0x1f1   : > { %v2161_v3 = vmax.f32 %v2129_v38, 0.0  ;;  %v2225_v0 = vmax.f32 %v2193_v60, 0.0  ;;  %v1990_v59 = vadd.f32 %v3630_v21, %v1829_v27  ;;  %3790 = vmatmul.mubr.f32.gmra.mxu0 %v2256_v42 }
 0x1f3   : > { %v2130_v48 = vadd.f32 %v4761_v61, %v1990_v59  ;;  %v2194_v46 = vsub.f32 %v4761_v61, %v1990_v59  ;;  %v2257_v51 = vadd.f32 %v2225_v0, %v2161_v3 }
 0x1f5   : > { %v2162_v34 = vmax.f32 %v2130_v48, 0.0  ;;  %v2226_v52 = vmax.f32 %v2194_v46, 0.0  ;;  %3792 = vmatprep.mubr.f32.mxu0 %v2257_v51 }
 0x1f7   : > { %v2258_v43 = vadd.f32 %v2226_v52, %v2162_v34 }
 0x1f9   : > { %3793 = vmatmul.mubr.f32.gmra.mxu0 %v2258_v43 }
 0x241   : > { %v3749_v44 = vpop.f32.mrf.mxu0 }
 0x242   : > { %v2354_v11 = vadd.f32 %v3749_v44, %v4873_v29 }
 0x243   : > { %v2348_v39 = vpop.f32.mrf.mxu0 }
 0x244   : > { %v2349_v28 = vadd.f32 %v4873_v29, %v2348_v39  ;;  %v2508_v61 = vmax.f32 %v2354_v11, 0.0 }
 0x246   : > { %v2507_v56 = vmax.f32 %v2349_v28, 0.0 }
 0x248   : > { %3803 = vmatprep.mubr.msk.f32.mxu1 %vm2550_vm0, %v2507_v56 }
 0x249   : > { %v3752_v6 = vpop.f32.mrf.mxu0  ;;  %3804 = vmatmul.mubr.msk.f32.vlgmr.msra.gmra.mxu1 %vm2550_vm0, %v2508_v61 }
 0x24a   : > { %v2364_v57 = vadd.f32 %v3752_v6, %v4873_v29 }
 0x24b   : > { %v2358_v4 = vpop.f32.mrf.mxu0 }
 0x24c   : > { %v2359_v20 = vadd.f32 %v4873_v29, %v2358_v4  ;;  %v2510_v7 = vmax.f32 %v2364_v57, 0.0 }
 0x24e   : > { %v2509_v15 = vmax.f32 %v2359_v20, 0.0 }
 0x250   : > { %3806 = vmatprep.mubr.msk.f32.mxu1 %vm2550_vm0, %v2509_v15 }
 0x251   : > { %v3755_v8 = vpop.f32.mrf.mxu0  ;;  %3807 = vmatmul.mubr.msk.f32.gmra.mxu1 %vm2550_vm0, %v2510_v7 }
 0x252   : > { %v2374_v31 = vadd.f32 %v3755_v8, %v4873_v29 }
 0x253   : > { %v2368_v5 = vpop.f32.mrf.mxu0 }
 0x254   : > { %v2369_v10 = vadd.f32 %v4873_v29, %v2368_v5  ;;  %v2512_v9 = vmax.f32 %v2374_v31, 0.0 }
 0x256   : > { %v2511_v26 = vmax.f32 %v2369_v10, 0.0 }
 0x258   : > { %3809 = vmatprep.mubr.msk.f32.mxu1 %vm2550_vm0, %v2511_v26 }
 0x259   : > { %v3758_v63 = vpop.f32.mrf.mxu0  ;;  %3810 = vmatmul.mubr.msk.f32.gmra.mxu1 %vm2550_vm0, %v2512_v9 }
 0x25a   : > { %v2384_v16 = vadd.f32 %v3758_v63, %v4873_v29 }
 0x25b   : > { %v2378_v24 = vpop.f32.mrf.mxu0 }
 0x25c   : > { %v2379_v17 = vadd.f32 %v4873_v29, %v2378_v24  ;;  %v2514_v47 = vmax.f32 %v2384_v16, 0.0 }
 0x25e   : > { %v2513_v53 = vmax.f32 %v2379_v17, 0.0 }
 0x260   : > { %3812 = vmatprep.mubr.msk.f32.mxu1 %vm2550_vm0, %v2513_v53 }
 0x261   : > { %v3761_v22 = vpop.f32.mrf.mxu0  ;;  %3813 = vmatmul.mubr.msk.f32.gmra.mxu1 %vm2550_vm0, %v2514_v47 }
 0x262   : > { %v2394_v12 = vadd.f32 %v3761_v22, %v4873_v29 }
 0x263   : > { %v2388_v1 = vpop.f32.mrf.mxu0 }
 0x264   : > { %v2389_v62 = vadd.f32 %v4873_v29, %v2388_v1  ;;  %v2516_v30 = vmax.f32 %v2394_v12, 0.0 }
 0x266   : > { %v2515_v23 = vmax.f32 %v2389_v62, 0.0 }
 0x268   : > { %3815 = vmatprep.mubr.msk.f32.mxu1 %vm2550_vm0, %v2515_v23 }
 0x269   : > { %v3764_v49 = vpop.f32.mrf.mxu0  ;;  %3816 = vmatmul.mubr.msk.f32.gmra.mxu1 %vm2550_vm0, %v2516_v30 }
 0x26a   : > { %v2404_v36 = vadd.f32 %v3764_v49, %v4873_v29 }
 0x26b   : > { %v2398_v13 = vpop.f32.mrf.mxu0 }
 0x26c   : > { %v2399_v45 = vadd.f32 %v4873_v29, %v2398_v13  ;;  %v2518_v54 = vmax.f32 %v2404_v36, 0.0 }
 0x26e   : > { %v2517_v19 = vmax.f32 %v2399_v45, 0.0  ;;  %v4943_v45 = vld [vmem:[%s5030_s7] ss:$0 sm:$0xff] }
 0x270   : > { %3818 = vmatprep.mubr.msk.f32.mxu1 %vm2550_vm0, %v2517_v19 }
 0x271   : > { %v3767_v50 = vpop.f32.mrf.mxu0  ;;  %3819 = vmatmul.mubr.msk.f32.gmra.mxu1 %vm2550_vm0, %v2518_v54 }
 0x272   : > { %v2414_v55 = vadd.f32 %v3767_v50, %v4873_v29 }
 0x273   : > { %v2408_v58 = vpop.f32.mrf.mxu0 }
 0x274   : > { %v2409_v32 = vadd.f32 %v4873_v29, %v2408_v58  ;;  %v2520_v33 = vmax.f32 %v2414_v55, 0.0 }
 0x276   : > { %v2519_v25 = vmax.f32 %v2409_v32, 0.0 }
 0x278   : > { %3821 = vmatprep.mubr.msk.f32.mxu1 %vm2550_vm0, %v2519_v25 }
 0x279   : > { %v3770_v18 = vpop.f32.mrf.mxu0  ;;  %3822 = vmatmul.mubr.msk.f32.gmra.mxu1 %vm2550_vm0, %v2520_v33 }
 0x27a   : > { %v2424_v2 = vadd.f32 %v3770_v18, %v4873_v29 }
 0x27b   : > { %v2418_v37 = vpop.f32.mrf.mxu0 }
 0x27c   : > { %v2419_v35 = vadd.f32 %v4873_v29, %v2418_v37  ;;  %v2522_v14 = vmax.f32 %v2424_v2, 0.0 }
 0x27e   : > { %v2521_v40 = vmax.f32 %v2419_v35, 0.0 }
 0x280   : > { %3824 = vmatprep.mubr.msk.f32.mxu1 %vm2550_vm0, %v2521_v40 }
 0x281   : > { %v3773_v41 = vpop.f32.mrf.mxu0  ;;  %3825 = vmatmul.mubr.msk.f32.gmra.mxu1 %vm2550_vm0, %v2522_v14 }
 0x282   : > { %v2434_v21 = vadd.f32 %v3773_v41, %v4873_v29 }
 0x283   : > { %v2428_v42 = vpop.f32.mrf.mxu0 }
 0x284   : > { %v2429_v38 = vadd.f32 %v4873_v29, %v2428_v42  ;;  %v2524_v27 = vmax.f32 %v2434_v21, 0.0 }
 0x286   : > { %v2523_v60 = vmax.f32 %v2429_v38, 0.0 }
 0x288   : > { %3827 = vmatprep.mubr.msk.f32.mxu1 %vm2550_vm0, %v2523_v60 }
 0x289   : > { %v3776_v3 = vpop.f32.mrf.mxu0  ;;  %3828 = vmatmul.mubr.msk.f32.gmra.mxu1 %vm2550_vm0, %v2524_v27 }
 0x28a   : > { %v2444_v0 = vadd.f32 %v3776_v3, %v4873_v29 }
 0x28b   : > { %v2438_v59 = vpop.f32.mrf.mxu0 }
 0x28c   : > { %v2439_v48 = vadd.f32 %v4873_v29, %v2438_v59  ;;  %v2526_v51 = vmax.f32 %v2444_v0, 0.0 }
 0x28e   : > { %v2525_v46 = vmax.f32 %v2439_v48, 0.0 }
 0x290   : > { %3830 = vmatprep.mubr.msk.f32.mxu1 %vm2550_vm0, %v2525_v46 }
 0x291   : > { %v3779_v34 = vpop.f32.mrf.mxu0  ;;  %3831 = vmatmul.mubr.msk.f32.gmra.mxu1 %vm2550_vm0, %v2526_v51 }
 0x292   : > { %v2454_v52 = vadd.f32 %v3779_v34, %v4873_v29 }
 0x293   : > { %v2448_v43 = vpop.f32.mrf.mxu0 }
 0x294   : > { %v2449_v44 = vadd.f32 %v4873_v29, %v2448_v43  ;;  %v2528_v39 = vmax.f32 %v2454_v52, 0.0 }
 0x296   : > { %v2527_v11 = vmax.f32 %v2449_v44, 0.0 }
 0x298   : > { %3833 = vmatprep.mubr.msk.f32.mxu1 %vm2550_vm0, %v2527_v11 }
 0x299   : > { %v3782_v28 = vpop.f32.mrf.mxu0  ;;  %3834 = vmatmul.mubr.msk.f32.gmra.mxu1 %vm2550_vm0, %v2528_v39 }
 0x29a   : > { %v2464_v56 = vadd.f32 %v3782_v28, %v4873_v29 }
 0x29b   : > { %v2458_v61 = vpop.f32.mrf.mxu0 }
 0x29c   : > { %v2459_v6 = vadd.f32 %v4873_v29, %v2458_v61  ;;  %v2530_v4 = vmax.f32 %v2464_v56, 0.0 }
 0x29e   : > { %v2529_v57 = vmax.f32 %v2459_v6, 0.0 }
 0x2a0   : > { %3836 = vmatprep.mubr.msk.f32.mxu1 %vm2550_vm0, %v2529_v57 }
 0x2a1   : > { %v3785_v20 = vpop.f32.mrf.mxu0  ;;  %3837 = vmatmul.mubr.msk.f32.gmra.mxu1 %vm2550_vm0, %v2530_v4 }
 0x2a2   : > { %v2474_v15 = vadd.f32 %v3785_v20, %v4873_v29 }
 0x2a3   : > { %v2468_v7 = vpop.f32.mrf.mxu0 }
 0x2a4   : > { %v2469_v8 = vadd.f32 %v4873_v29, %v2468_v7  ;;  %v2532_v5 = vmax.f32 %v2474_v15, 0.0 }
 0x2a6   : > { %v2531_v31 = vmax.f32 %v2469_v8, 0.0 }
 0x2a8   : > { %3839 = vmatprep.mubr.msk.f32.mxu1 %vm2550_vm0, %v2531_v31 }
 0x2a9   : > { %v3788_v10 = vpop.f32.mrf.mxu0  ;;  %3840 = vmatmul.mubr.msk.f32.gmra.mxu1 %vm2550_vm0, %v2532_v5 }
 0x2aa   : > { %v2484_v26 = vadd.f32 %v3788_v10, %v4873_v29 }
 0x2ab   : > { %v2478_v9 = vpop.f32.mrf.mxu0 }
 0x2ac   : > { %v2479_v63 = vadd.f32 %v4873_v29, %v2478_v9  ;;  %v2534_v24 = vmax.f32 %v2484_v26, 0.0 }
 0x2ae   : > { %v2533_v16 = vmax.f32 %v2479_v63, 0.0 }
 0x2b0   : > { %3842 = vmatprep.mubr.msk.f32.mxu1 %vm2550_vm0, %v2533_v16 }
 0x2b1   : > { %v3791_v17 = vpop.f32.mrf.mxu0  ;;  %3843 = vmatmul.mubr.msk.f32.gmra.mxu1 %vm2550_vm0, %v2534_v24 }
 0x2b2   : > { %v2494_v53 = vadd.f32 %v3791_v17, %v4873_v29 }
 0x2b3   : > { %v2488_v47 = vpop.f32.mrf.mxu0 }
 0x2b4   : > { %v2489_v22 = vadd.f32 %v4873_v29, %v2488_v47  ;;  %v2536_v1 = vmax.f32 %v2494_v53, 0.0 }
 0x2b6   : > { %v2535_v12 = vmax.f32 %v2489_v22, 0.0 }
 0x2b8   : > { %3845 = vmatprep.mubr.msk.f32.mxu1 %vm2550_vm0, %v2535_v12 }
 0x2b9   : > { %v3794_v62 = vpop.f32.mrf.mxu0  ;;  %3846 = vmatmul.mubr.msk.f32.gmra.mxu1 %vm2550_vm0, %v2536_v1 }
 0x2ba   : > { %v2504_v23 = vadd.f32 %v3794_v62, %v4873_v29 }
 0x2bb   : > { %v2498_v30 = vpop.f32.mrf.mxu0 }
 0x2bc   : > { %v2499_v49 = vadd.f32 %v4873_v29, %v2498_v30  ;;  %v2538_v13 = vmax.f32 %v2504_v23, 0.0 }
 0x2be   : > { %v2537_v36 = vmax.f32 %v2499_v49, 0.0 }
 0x2c0   : > { %3848 = vmatprep.mubr.msk.f32.mxu1 %vm2550_vm0, %v2537_v36 }
 0x2c1   : > { %3849 = vmatmul.mubr.msk.f32.gmra.mxu1 %vm2550_vm0, %v2538_v13 }
 0x309   : > { %v3805_v29 = vpop.f32.mrf.mxu1 }
 0x30a   : > { %v2719_v19 = vadd.f32 %v3805_v29, %v4943_v45 }
 0x30b   : > { %v2713_v54 = vpop.f32.mrf.mxu1 }
 0x30c   : > { %2873 = vst [vmem:[%s4948_s27 + $0x8] sm:$0xff] %v2719_v19  ;;  %v2714_v50 = vadd.f32 %v4943_v45, %v2713_v54 }
 0x30e   : > { %2872 = vst [vmem:[%s4948_s27] sm:$0xff] %v2714_v50 }
 0x311   : > { %v3808_v55 = vpop.f32.mrf.mxu1 }
 0x312   : > { %v2729_v58 = vadd.f32 %v3808_v55, %v4943_v45 }
 0x313   : > { %v2723_v32 = vpop.f32.mrf.mxu1 }
 0x314   : > { %2875 = vst [vmem:[%s4948_s27 + $0x18] sm:$0xff] %v2729_v58  ;;  %v2724_v25 = vadd.f32 %v4943_v45, %v2723_v32 }
 0x316   : > { %2874 = vst [vmem:[%s4948_s27 + $0x10] sm:$0xff] %v2724_v25 }
 0x319   : > { %v3811_v33 = vpop.f32.mrf.mxu1 }
 0x31a   : > { %v2739_v18 = vadd.f32 %v3811_v33, %v4943_v45 }
 0x31b   : > { %v2733_v2 = vpop.f32.mrf.mxu1 }
 0x31c   : > { %2877 = vst [vmem:[%s4948_s27 + $0x28] sm:$0xff] %v2739_v18  ;;  %v2734_v37 = vadd.f32 %v4943_v45, %v2733_v2 }
 0x31e   : > { %2876 = vst [vmem:[%s4948_s27 + $0x20] sm:$0xff] %v2734_v37 }
 0x321   : > { %v3814_v35 = vpop.f32.mrf.mxu1 }
 0x322   : > { %v2749_v40 = vadd.f32 %v3814_v35, %v4943_v45 }
 0x323   : > { %v2743_v14 = vpop.f32.mrf.mxu1 }
 0x324   : > { %2879 = vst [vmem:[%s4948_s27 + $0x38] sm:$0xff] %v2749_v40  ;;  %v2744_v41 = vadd.f32 %v4943_v45, %v2743_v14 }
 0x326   : > { %2878 = vst [vmem:[%s4948_s27 + $0x30] sm:$0xff] %v2744_v41 }
 0x329   : > { %v3817_v21 = vpop.f32.mrf.mxu1 }
 0x32a   : > { %v2759_v42 = vadd.f32 %v3817_v21, %v4943_v45 }
 0x32b   : > { %v2753_v38 = vpop.f32.mrf.mxu1 }
 0x32c   : > { %2881 = vst [vmem:[%s4948_s27 + $0x48] sm:$0xff] %v2759_v42  ;;  %v2754_v60 = vadd.f32 %v4943_v45, %v2753_v38 }
 0x32e   : > { %2880 = vst [vmem:[%s4948_s27 + $0x40] sm:$0xff] %v2754_v60 }
 0x331   : > { %v3820_v27 = vpop.f32.mrf.mxu1 }
 0x332   : > { %v2769_v3 = vadd.f32 %v3820_v27, %v4943_v45 }
 0x333   : > { %v2763_v0 = vpop.f32.mrf.mxu1 }
 0x334   : > { %2883 = vst [vmem:[%s4948_s27 + $0x58] sm:$0xff] %v2769_v3  ;;  %v2764_v59 = vadd.f32 %v4943_v45, %v2763_v0 }
 0x336   : > { %2882 = vst [vmem:[%s4948_s27 + $0x50] sm:$0xff] %v2764_v59 }
 0x339   : > { %v3823_v48 = vpop.f32.mrf.mxu1 }
 0x33a   : > { %v2779_v46 = vadd.f32 %v3823_v48, %v4943_v45 }
 0x33b   : > { %v2773_v51 = vpop.f32.mrf.mxu1 }
 0x33c   : > { %2885 = vst [vmem:[%s4948_s27 + $0x68] sm:$0xff] %v2779_v46  ;;  %v2774_v34 = vadd.f32 %v4943_v45, %v2773_v51 }
 0x33e   : > { %2884 = vst [vmem:[%s4948_s27 + $0x60] sm:$0xff] %v2774_v34 }
 0x341   : > { %v3826_v52 = vpop.f32.mrf.mxu1 }
 0x342   : > { %v2789_v43 = vadd.f32 %v3826_v52, %v4943_v45 }
 0x343   : > { %v2783_v44 = vpop.f32.mrf.mxu1 }
 0x344   : > { %2887 = vst [vmem:[%s4948_s27 + $0x78] sm:$0xff] %v2789_v43  ;;  %v2784_v11 = vadd.f32 %v4943_v45, %v2783_v44 }
 0x346   : > { %2886 = vst [vmem:[%s4948_s27 + $0x70] sm:$0xff] %v2784_v11 }
 0x349   : > { %v3829_v39 = vpop.f32.mrf.mxu1 }
 0x34a   : > { %v2799_v28 = vadd.f32 %v3829_v39, %v4943_v45 }
 0x34b   : > { %v2793_v56 = vpop.f32.mrf.mxu1 }
 0x34c   : > { %2889 = vst [vmem:[%s4948_s27 + $0x88] sm:$0xff] %v2799_v28  ;;  %v2794_v61 = vadd.f32 %v4943_v45, %v2793_v56 }
 0x34e   : > { %2888 = vst [vmem:[%s4948_s27 + $0x80] sm:$0xff] %v2794_v61 }
 0x351   : > { %v3832_v6 = vpop.f32.mrf.mxu1 }
 0x352   : > { %v2809_v57 = vadd.f32 %v3832_v6, %v4943_v45 }
 0x353   : > { %v2803_v4 = vpop.f32.mrf.mxu1 }
 0x354   : > { %2891 = vst [vmem:[%s4948_s27 + $0x98] sm:$0xff] %v2809_v57  ;;  %v2804_v20 = vadd.f32 %v4943_v45, %v2803_v4 }
 0x356   : > { %2890 = vst [vmem:[%s4948_s27 + $0x90] sm:$0xff] %v2804_v20 }
 0x359   : > { %v3835_v15 = vpop.f32.mrf.mxu1 }
 0x35a   : > { %v2819_v7 = vadd.f32 %v3835_v15, %v4943_v45 }
 0x35b   : > { %v2813_v8 = vpop.f32.mrf.mxu1 }
 0x35c   : > { %2893 = vst [vmem:[%s4948_s27 + $0xa8] sm:$0xff] %v2819_v7  ;;  %v2814_v31 = vadd.f32 %v4943_v45, %v2813_v8 }
 0x35e   : > { %2892 = vst [vmem:[%s4948_s27 + $0xa0] sm:$0xff] %v2814_v31 }
 0x361   : > { %v3838_v5 = vpop.f32.mrf.mxu1 }
 0x362   : > { %v2829_v10 = vadd.f32 %v3838_v5, %v4943_v45 }
 0x363   : > { %v2823_v26 = vpop.f32.mrf.mxu1 }
 0x364   : > { %2895 = vst [vmem:[%s4948_s27 + $0xb8] sm:$0xff] %v2829_v10  ;;  %v2824_v9 = vadd.f32 %v4943_v45, %v2823_v26 }
 0x366   : > { %2894 = vst [vmem:[%s4948_s27 + $0xb0] sm:$0xff] %v2824_v9 }
 0x369   : > { %v3841_v63 = vpop.f32.mrf.mxu1 }
 0x36a   : > { %v2839_v16 = vadd.f32 %v3841_v63, %v4943_v45 }
 0x36b   : > { %v2833_v24 = vpop.f32.mrf.mxu1 }
 0x36c   : > { %2897 = vst [vmem:[%s4948_s27 + $0xc8] sm:$0xff] %v2839_v16  ;;  %v2834_v17 = vadd.f32 %v4943_v45, %v2833_v24 }
 0x36e   : > { %2896 = vst [vmem:[%s4948_s27 + $0xc0] sm:$0xff] %v2834_v17 }
 0x371   : > { %v3844_v53 = vpop.f32.mrf.mxu1 }
 0x372   : > { %v2849_v47 = vadd.f32 %v3844_v53, %v4943_v45 }
 0x373   : > { %v2843_v22 = vpop.f32.mrf.mxu1 }
 0x374   : > { %2899 = vst [vmem:[%s4948_s27 + $0xd8] sm:$0xff] %v2849_v47  ;;  %v2844_v12 = vadd.f32 %v4943_v45, %v2843_v22 }
 0x376   : > { %2898 = vst [vmem:[%s4948_s27 + $0xd0] sm:$0xff] %v2844_v12 }
 0x379   : > { %v3847_v1 = vpop.f32.mrf.mxu1 }
 0x37a   : > { %v2859_v62 = vadd.f32 %v3847_v1, %v4943_v45 }
 0x37b   : > { %v2853_v23 = vpop.f32.mrf.mxu1 }
 0x37c   : > { %2901 = vst [vmem:[%s4948_s27 + $0xe8] sm:$0xff] %v2859_v62  ;;  %v2854_v30 = vadd.f32 %v4943_v45, %v2853_v23 }
 0x37e   : > { %2900 = vst [vmem:[%s4948_s27 + $0xe0] sm:$0xff] %v2854_v30 }
 0x381   : > { %v3850_v49 = vpop.f32.mrf.mxu1 }
 0x382   : > { %v2869_v36 = vadd.f32 %v3850_v49, %v4943_v45 }
 0x383   : > { %v2863_v13 = vpop.f32.mrf.mxu1 }
 0x384   : > { %2903 = vst [vmem:[%s4948_s27 + $0xf8] sm:$0xff] %v2869_v36  ;;  %v2864_v29 = vadd.f32 %v4943_v45, %v2863_v13 }
 0x386   : > { %2902 = vst [vmem:[%s4948_s27 + $0xf0] sm:$0xff] %v2864_v29 }
 0x387 PF: > { %s18_s29 = sadd.s32 1, %s4057_s29   ;;  %s5032_s27 = smov %s4053_s28 }
 0x388   : > { %p15_p5 = scmp.ge.s32.totalorder %s18_s29, 4   ;;  %s5033_s28 = smov %s5035_s30 }
 0x38a   :  { %17 = sbr.rel (!%p15_p5) target bundleno = 2 (0x2), region = 96 }

</bundles_post_ra>
